<compile_context>
chip_gen: v6e
topology: v6e:2x2x1
jax: 0.10.0
libtpu: 0.0.40
codegen_flags: <defaults>
</compile_context>

<pallas_src>
import jax
import jax.numpy as jnp
from jax import lax
from jax.experimental import pallas as pl
from jax.experimental.pallas import tpu as pltpu

# ---------------- config (small, consistent with the module) ----------------
B = 2            # outer batch
C_IN = 4         # c_in (= "n" in the rearrange)
Q_LEN = 8        # q_len == seg_num == out_seg_num
DIM = 32         # d_model
PAD_SIZE = 2     # pad along the channel axis before attention
LOCAL_SIZE = 2   # unused (see TODO above)
MLP_RATIO = 4
NUM_HEADS = 2
HEAD_DIM = DIM // NUM_HEADS
MLP_HIDDEN = Q_LEN * MLP_RATIO
LN_EPS = 1e-5

N_PAD = C_IN + PAD_SIZE          # 6 channel tokens per (b, s) group after padding
R_IN = C_IN * Q_LEN              # 32 rows per batch element, ordered (n, s)
R_AT = Q_LEN * N_PAD             # 48 attention rows per batch element, ordered (s, n)
R_H = C_IN * MLP_HIDDEN          # 128 hidden rows per batch element (Mlp over seg)


# ----------------------------- fused kernel ---------------------------------
def _floor_div(idx, div, n_groups):
    """floor(idx / div) via compare-sum (avoids vector integer division)."""
    g = jnp.zeros_like(idx)
    for k in range(1, n_groups):
        g = g + (idx >= k * div).astype(jnp.int32)
    return g


def bhcgsam_kernel(x_ref, wattn_ref, vec_ref, w1b_ref, w2b_ref, bmlp_ref, o_ref):
    f32, bf16 = jnp.float32, jnp.bfloat16

    # ---- constants generated in-kernel (cheap integer VPU work, no HBM operands)
    at_col = lax.broadcasted_iota(jnp.int32, (R_AT, 1), 0)      # attention row idx (col vec)
    at_row = lax.broadcasted_iota(jnp.int32, (1, R_AT), 1)      # attention row idx (row vec)
    in_col = lax.broadcasted_iota(jnp.int32, (R_IN, 1), 0)      # input row idx (col vec)
    in_row = lax.broadcasted_iota(jnp.int32, (1, R_IN), 1)      # input row idx (row vec)

    s_at_c = _floor_div(at_col, N_PAD, Q_LEN); n_at_c = at_col - N_PAD * s_at_c
    s_at_r = _floor_div(at_row, N_PAD, Q_LEN); n_at_r = at_row - N_PAD * s_at_r
    n_in_c = _floor_div(in_col, Q_LEN, C_IN);  s_in_c = in_col - Q_LEN * n_in_c
    n_in_r = _floor_div(in_row, Q_LEN, C_IN);  s_in_r = in_row - Q_LEN * n_in_r

    # pad + rearrange '(n s) -> (s n_pad)' as a 0/1 matrix, pin: (R_AT, R_IN)
    pin = jnp.where((s_at_c == s_in_r) & (n_at_c == n_in_r), 1.0, 0.0).astype(bf16)
    # inverse rearrange / drop padded rows, psel: (R_IN, R_AT); psel @ pin == I
    psel = jnp.where((s_in_c == s_at_r) & (n_in_c == n_at_r), 1.0, 0.0).astype(bf16)
    # block-diagonal mask: attend only within the same (b, s) group of N_PAD tokens
    same_group = s_at_c == s_at_r                               # (R_AT, R_AT) bool

    lane = lax.broadcasted_iota(jnp.int32, (1, DIM), 1)         # for per-head lane masks

    # ---- packed small operands
    vec = vec_ref[...]                                          # (8, DIM) f32
    bq, bk, bv = vec[0:1, :], vec[1:2, :], vec[2:3, :]
    bproj = vec[3:4, :]
    g1, beta1 = vec[4:5, :], vec[5:6, :]
    g2, beta2 = vec[6:7, :], vec[7:8, :]

    # ---- stage 1: pad + rearrange (permutation matmul), 2-head attention
    x = x_ref[...]                                              # (R_IN, DIM) f32, rows = (n, s)
    x2 = jnp.dot(pin, x.astype(bf16), preferred_element_type=f32)      # (R_AT, DIM)
    x2b = x2.astype(bf16)

    # three independent lane-0-aligned projections (no lane slicing of a fused qkv)
    q = jnp.dot(x2b, wattn_ref[0], preferred_element_type=f32) + bq
    k = jnp.dot(x2b, wattn_ref[1], preferred_element_type=f32) + bk
    v = jnp.dot(x2b, wattn_ref[2], preferred_element_type=f32) + bv
    kb = k.astype(bf16)

    scale = HEAD_DIM ** -0.5
    attn = jnp.zeros((R_AT, DIM), f32)
    for h in range(NUM_HEADS):                                  # static, 2 heads
        m = ((lane >= h * HEAD_DIM) & (lane < (h + 1) * HEAD_DIM)).astype(f32)
        qh = (q * m).astype(bf16)      # zeroed lanes contribute 0 to the contraction
        vh = (v * m).astype(bf16)      # masked V keeps the output head-lane aligned
        s = jnp.einsum('qd,kd->qk', qh, kb, preferred_element_type=f32) * scale
        s = jnp.where(same_group, s, -1e30)
        s = s - jnp.max(s, axis=-1, keepdims=True)
        p = jnp.exp(s)
        p = p / jnp.sum(p, axis=-1, keepdims=True)              # exact division (parity)
        attn = attn + jnp.dot(p.astype(bf16), vh, preferred_element_type=f32)

    attn = jnp.dot(attn.astype(bf16), wattn_ref[3], preferred_element_type=f32) + bproj

    # residual + LN1.  Since psel @ pin == I, the residual uses the exact f32 input
    # (only the attention branch passes through bf16); LayerNorm is row-wise so it
    # commutes with the drop-pad / inverse-rearrange permutation.
    y = x + jnp.dot(psel, attn.astype(bf16), preferred_element_type=f32)   # (R_IN, DIM)
    mu1 = jnp.mean(y, axis=-1, keepdims=True)
    var1 = jnp.mean((y - mu1) ** 2, axis=-1, keepdims=True)
    x3 = (y - mu1) * lax.rsqrt(var1 + LN_EPS) * g1 + beta1

    # ---- stage 2: Mlp over the seg axis as block-diagonal kron matmuls, +res, LN2
    b1c = bmlp_ref[0:R_H, :]                                    # (R_H, 1)
    b2c = bmlp_ref[R_H:R_H + R_IN, :]                           # (R_IN, 1)
    h1 = jnp.dot(w1b_ref[...], x3.astype(bf16), preferred_element_type=f32) + b1c
    h1 = jnp.maximum(h1, 0.0)                                   # ReLU
    mlp = jnp.dot(w2b_ref[...], h1.astype(bf16), preferred_element_type=f32) + b2c

    y2 = x3 + mlp
    mu2 = jnp.mean(y2, axis=-1, keepdims=True)
    var2 = jnp.mean((y2 - mu2) ** 2, axis=-1, keepdims=True)
    o_ref[...] = (y2 - mu2) * lax.rsqrt(var2 + LN_EPS) * g2 + beta2


# ------------------------------ full forward --------------------------------
def pack_params(p):
    """One-time packing of raw module parameters into kernel operands
    (kron / tile construction hoisted out of the forward pass)."""
    wq = p["wqkv"][:, 0 * DIM:1 * DIM]
    wk = p["wqkv"][:, 1 * DIM:2 * DIM]
    wv = p["wqkv"][:, 2 * DIM:3 * DIM]
    w_attn = jnp.stack([wq, wk, wv, p["wproj"]], axis=0).astype(jnp.bfloat16)   # (4, D, D)
    vec = jnp.stack(
        [p["bqkv"][0 * DIM:1 * DIM], p["bqkv"][1 * DIM:2 * DIM],
         p["bqkv"][2 * DIM:3 * DIM], p["bproj"],
         p["g1"], p["beta1"], p["g2"], p["beta2"]], axis=0).astype(jnp.float32)  # (8, D)
    eye = jnp.eye(C_IN, dtype=jnp.float32)
    w1b = jnp.kron(eye, p["w1"].T).astype(jnp.bfloat16)          # (R_H, R_IN)  = (128, 32)
    w2b = jnp.kron(eye, p["w2"].T).astype(jnp.bfloat16)          # (R_IN, R_H)  = (32, 128)
    bmlp = jnp.concatenate([jnp.tile(p["b1"], C_IN),
                            jnp.tile(p["b2"], C_IN)])[:, None].astype(jnp.float32)  # (160, 1)
    return {"w_attn": w_attn, "vec": vec, "w1b": w1b, "w2b": w2b, "bmlp": bmlp}


def bhcgsam_forward(x, kp):
    # x: (B*C_IN, Q_LEN, DIM); rows of x_flat ordered (b, n, s)
    x_flat = x.reshape(B * C_IN * Q_LEN, DIM)                   # contiguous, free

    grid_spec = pltpu.PrefetchScalarGridSpec(
        num_scalar_prefetch=0,
        grid=(B,),                                              # one batch element per step
        in_specs=[
            pl.BlockSpec((R_IN, DIM), lambda b: (b, 0)),         # x
            pl.BlockSpec((4, DIM, DIM), lambda b: (0, 0, 0)),    # [wq, wk, wv, wproj] bf16
            pl.BlockSpec((8, DIM), lambda b: (0, 0)),            # packed bias / LN vectors
            pl.BlockSpec((R_H, R_IN), lambda b: (0, 0)),         # kron(I, w1.T) bf16
            pl.BlockSpec((R_IN, R_H), lambda b: (0, 0)),         # kron(I, w2.T) bf16
            pl.BlockSpec((R_H + R_IN, 1), lambda b: (0, 0)),     # [tile(b1); tile(b2)] column
        ],
        out_specs=pl.BlockSpec((R_IN, DIM), lambda b: (b, 0)),
    )
    out_flat = pl.pallas_call(
        bhcgsam_kernel,
        out_shape=jax.ShapeDtypeStruct((B * C_IN * Q_LEN, DIM), jnp.float32),
        grid_spec=grid_spec,
        compiler_params=pltpu.CompilerParams(dimension_semantics=("parallel",)),
    )(x_flat, kp["w_attn"], kp["vec"], kp["w1b"], kp["w2b"], kp["bmlp"])
    return out_flat.reshape(B * C_IN, Q_LEN, DIM)               # contiguous, free


def init_params(key):
    ks = jax.random.split(key, 4)
    return {
        # BHCGSA (2-head self-attention)
        "wqkv": jax.random.normal(ks[0], (DIM, 3 * DIM), jnp.float32) * 0.02,
        "bqkv": jnp.zeros((3 * DIM,), jnp.float32),
        "wproj": jax.random.normal(ks[1], (DIM, DIM), jnp.float32) * 0.02,
        "bproj": jnp.zeros((DIM,), jnp.float32),
        # norm1 / norm2 (LayerNorm(dim))
        "g1": jnp.ones((DIM,), jnp.float32),
        "beta1": jnp.zeros((DIM,), jnp.float32),
        "g2": jnp.ones((DIM,), jnp.float32),
        "beta2": jnp.zeros((DIM,), jnp.float32),
        # Mlp over the q_len axis (weights stored (in, out))
        "w1": jax.random.normal(ks[2], (Q_LEN, MLP_HIDDEN), jnp.float32) * 0.02,
        "b1": jnp.zeros((MLP_HIDDEN,), jnp.float32),
        "w2": jax.random.normal(ks[3], (MLP_HIDDEN, Q_LEN), jnp.float32) * 0.02,
        "b2": jnp.zeros((Q_LEN,), jnp.float32),
    }


if __name__ == "__main__":
    key = jax.random.PRNGKey(0)
    kx, kparam = jax.random.split(key)
    x = jax.random.normal(kx, (B * C_IN, Q_LEN, DIM), jnp.float32)
    params = init_params(kparam)
    kernel_params = pack_params(params)          # hoisted: runs once, not per forward

    fwd = jax.jit(bhcgsam_forward)
    out = jax.block_until_ready(fwd(x, kernel_params))
    assert out.shape == (B * C_IN, Q_LEN, DIM)
    assert bool(jnp.isfinite(out).all())
    print("KERNEL_OK")
</pallas_src>

<mosaic_0001>
module attributes {stable_mosaic.version = 11 : i64} {
  func.func @bhcgsam_kernel(%arg0: i32, %arg1: memref<32x32xf32, #tpu.memory_space<vmem>>, %arg2: memref<4x32x32xbf16, #tpu.memory_space<vmem>>, %arg3: memref<8x32xf32, #tpu.memory_space<vmem>>, %arg4: memref<128x32xbf16, #tpu.memory_space<vmem>>, %arg5: memref<32x128xbf16, #tpu.memory_space<vmem>>, %arg6: memref<160x1xf32, #tpu.memory_space<vmem>>, %arg7: memref<32x32xf32, #tpu.memory_space<vmem>>) attributes {dimension_semantics = [#tpu.dimension_semantics<parallel>], iteration_bounds = array<i64: 2>, scalar_prefetch = 0 : i64, scratch_operands = 0 : i64, tpu.core_type = #tpu.core_type<tc>, window_params = [{transform_indices = @transform_0, window_bounds = array<i64: 32, 32>}, {pipeline_mode = #tpu.pipeline_mode<synchronous>, transform_indices = @transform_1, window_bounds = array<i64: 4, 32, 32>}, {pipeline_mode = #tpu.pipeline_mode<synchronous>, transform_indices = @transform_2, window_bounds = array<i64: 8, 32>}, {pipeline_mode = #tpu.pipeline_mode<synchronous>, transform_indices = @transform_3, window_bounds = array<i64: 128, 32>}, {pipeline_mode = #tpu.pipeline_mode<synchronous>, transform_indices = @transform_4, window_bounds = array<i64: 32, 128>}, {pipeline_mode = #tpu.pipeline_mode<synchronous>, transform_indices = @transform_5, window_bounds = array<i64: 160, 1>}, {transform_indices = @transform_6, window_bounds = array<i64: 32, 32>}]} {
    %0 = tpu.iota {dimensions = array<i32: 0>} : vector<48x1xi32>
    %1 = tpu.iota {dimensions = array<i32: 1>} : vector<1x48xi32>
    %2 = tpu.iota {dimensions = array<i32: 0>} : vector<32x1xi32>
    %3 = tpu.iota {dimensions = array<i32: 1>} : vector<1x32xi32>
    %c0_i32 = arith.constant 0 : i32
    %4 = vector.broadcast %c0_i32 : i32 to vector<48x1xi32>
    %c6_i32 = arith.constant 6 : i32
    %5 = vector.broadcast %c6_i32 : i32 to vector<48x1xi32>
    %6 = arith.cmpi sge, %0, %5 : vector<48x1xi32>
    %7 = arith.extui %6 : vector<48x1xi1> to vector<48x1xi32>
    %8 = arith.addi %4, %7 : vector<48x1xi32>
    %c12_i32 = arith.constant 12 : i32
    %9 = vector.broadcast %c12_i32 : i32 to vector<48x1xi32>
    %10 = arith.cmpi sge, %0, %9 : vector<48x1xi32>
    %11 = arith.extui %10 : vector<48x1xi1> to vector<48x1xi32>
    %12 = arith.addi %8, %11 : vector<48x1xi32>
    %c18_i32 = arith.constant 18 : i32
    %13 = vector.broadcast %c18_i32 : i32 to vector<48x1xi32>
    %14 = arith.cmpi sge, %0, %13 : vector<48x1xi32>
    %15 = arith.extui %14 : vector<48x1xi1> to vector<48x1xi32>
    %16 = arith.addi %12, %15 : vector<48x1xi32>
    %c24_i32 = arith.constant 24 : i32
    %17 = vector.broadcast %c24_i32 : i32 to vector<48x1xi32>
    %18 = arith.cmpi sge, %0, %17 : vector<48x1xi32>
    %19 = arith.extui %18 : vector<48x1xi1> to vector<48x1xi32>
    %20 = arith.addi %16, %19 : vector<48x1xi32>
    %c30_i32 = arith.constant 30 : i32
    %21 = vector.broadcast %c30_i32 : i32 to vector<48x1xi32>
    %22 = arith.cmpi sge, %0, %21 : vector<48x1xi32>
    %23 = arith.extui %22 : vector<48x1xi1> to vector<48x1xi32>
    %24 = arith.addi %20, %23 : vector<48x1xi32>
    %c36_i32 = arith.constant 36 : i32
    %25 = vector.broadcast %c36_i32 : i32 to vector<48x1xi32>
    %26 = arith.cmpi sge, %0, %25 : vector<48x1xi32>
    %27 = arith.extui %26 : vector<48x1xi1> to vector<48x1xi32>
    %28 = arith.addi %24, %27 : vector<48x1xi32>
    %c42_i32 = arith.constant 42 : i32
    %29 = vector.broadcast %c42_i32 : i32 to vector<48x1xi32>
    %30 = arith.cmpi sge, %0, %29 : vector<48x1xi32>
    %31 = arith.extui %30 : vector<48x1xi1> to vector<48x1xi32>
    %32 = arith.addi %28, %31 : vector<48x1xi32>
    %c6_i32_0 = arith.constant 6 : i32
    %33 = vector.broadcast %c6_i32_0 : i32 to vector<48x1xi32>
    %34 = arith.muli %33, %32 : vector<48x1xi32>
    %35 = arith.subi %0, %34 : vector<48x1xi32>
    %c0_i32_1 = arith.constant 0 : i32
    %36 = vector.broadcast %c0_i32_1 : i32 to vector<1x48xi32>
    %c6_i32_2 = arith.constant 6 : i32
    %37 = vector.broadcast %c6_i32_2 : i32 to vector<1x48xi32>
    %38 = arith.cmpi sge, %1, %37 : vector<1x48xi32>
    %39 = arith.extui %38 : vector<1x48xi1> to vector<1x48xi32>
    %40 = arith.addi %36, %39 : vector<1x48xi32>
    %c12_i32_3 = arith.constant 12 : i32
    %41 = vector.broadcast %c12_i32_3 : i32 to vector<1x48xi32>
    %42 = arith.cmpi sge, %1, %41 : vector<1x48xi32>
    %43 = arith.extui %42 : vector<1x48xi1> to vector<1x48xi32>
    %44 = arith.addi %40, %43 : vector<1x48xi32>
    %c18_i32_4 = arith.constant 18 : i32
    %45 = vector.broadcast %c18_i32_4 : i32 to vector<1x48xi32>
    %46 = arith.cmpi sge, %1, %45 : vector<1x48xi32>
    %47 = arith.extui %46 : vector<1x48xi1> to vector<1x48xi32>
    %48 = arith.addi %44, %47 : vector<1x48xi32>
    %c24_i32_5 = arith.constant 24 : i32
    %49 = vector.broadcast %c24_i32_5 : i32 to vector<1x48xi32>
    %50 = arith.cmpi sge, %1, %49 : vector<1x48xi32>
    %51 = arith.extui %50 : vector<1x48xi1> to vector<1x48xi32>
    %52 = arith.addi %48, %51 : vector<1x48xi32>
    %c30_i32_6 = arith.constant 30 : i32
    %53 = vector.broadcast %c30_i32_6 : i32 to vector<1x48xi32>
    %54 = arith.cmpi sge, %1, %53 : vector<1x48xi32>
    %55 = arith.extui %54 : vector<1x48xi1> to vector<1x48xi32>
    %56 = arith.addi %52, %55 : vector<1x48xi32>
    %c36_i32_7 = arith.constant 36 : i32
    %57 = vector.broadcast %c36_i32_7 : i32 to vector<1x48xi32>
    %58 = arith.cmpi sge, %1, %57 : vector<1x48xi32>
    %59 = arith.extui %58 : vector<1x48xi1> to vector<1x48xi32>
    %60 = arith.addi %56, %59 : vector<1x48xi32>
    %c42_i32_8 = arith.constant 42 : i32
    %61 = vector.broadcast %c42_i32_8 : i32 to vector<1x48xi32>
    %62 = arith.cmpi sge, %1, %61 : vector<1x48xi32>
    %63 = arith.extui %62 : vector<1x48xi1> to vector<1x48xi32>
    %64 = arith.addi %60, %63 : vector<1x48xi32>
    %c6_i32_9 = arith.constant 6 : i32
    %65 = vector.broadcast %c6_i32_9 : i32 to vector<1x48xi32>
    %66 = arith.muli %65, %64 : vector<1x48xi32>
    %67 = arith.subi %1, %66 : vector<1x48xi32>
    %c0_i32_10 = arith.constant 0 : i32
    %68 = vector.broadcast %c0_i32_10 : i32 to vector<32x1xi32>
    %c8_i32 = arith.constant 8 : i32
    %69 = vector.broadcast %c8_i32 : i32 to vector<32x1xi32>
    %70 = arith.cmpi sge, %2, %69 : vector<32x1xi32>
    %71 = arith.extui %70 : vector<32x1xi1> to vector<32x1xi32>
    %72 = arith.addi %68, %71 : vector<32x1xi32>
    %c16_i32 = arith.constant 16 : i32
    %73 = vector.broadcast %c16_i32 : i32 to vector<32x1xi32>
    %74 = arith.cmpi sge, %2, %73 : vector<32x1xi32>
    %75 = arith.extui %74 : vector<32x1xi1> to vector<32x1xi32>
    %76 = arith.addi %72, %75 : vector<32x1xi32>
    %c24_i32_11 = arith.constant 24 : i32
    %77 = vector.broadcast %c24_i32_11 : i32 to vector<32x1xi32>
    %78 = arith.cmpi sge, %2, %77 : vector<32x1xi32>
    %79 = arith.extui %78 : vector<32x1xi1> to vector<32x1xi32>
    %80 = arith.addi %76, %79 : vector<32x1xi32>
    %c8_i32_12 = arith.constant 8 : i32
    %81 = vector.broadcast %c8_i32_12 : i32 to vector<32x1xi32>
    %82 = arith.muli %81, %80 : vector<32x1xi32>
    %83 = arith.subi %2, %82 : vector<32x1xi32>
    %c0_i32_13 = arith.constant 0 : i32
    %84 = vector.broadcast %c0_i32_13 : i32 to vector<1x32xi32>
    %c8_i32_14 = arith.constant 8 : i32
    %85 = vector.broadcast %c8_i32_14 : i32 to vector<1x32xi32>
    %86 = arith.cmpi sge, %3, %85 : vector<1x32xi32>
    %87 = arith.extui %86 : vector<1x32xi1> to vector<1x32xi32>
    %88 = arith.addi %84, %87 : vector<1x32xi32>
    %c16_i32_15 = arith.constant 16 : i32
    %89 = vector.broadcast %c16_i32_15 : i32 to vector<1x32xi32>
    %90 = arith.cmpi sge, %3, %89 : vector<1x32xi32>
    %91 = arith.extui %90 : vector<1x32xi1> to vector<1x32xi32>
    %92 = arith.addi %88, %91 : vector<1x32xi32>
    %c24_i32_16 = arith.constant 24 : i32
    %93 = vector.broadcast %c24_i32_16 : i32 to vector<1x32xi32>
    %94 = arith.cmpi sge, %3, %93 : vector<1x32xi32>
    %95 = arith.extui %94 : vector<1x32xi1> to vector<1x32xi32>
    %96 = arith.addi %92, %95 : vector<1x32xi32>
    %c8_i32_17 = arith.constant 8 : i32
    %97 = vector.broadcast %c8_i32_17 : i32 to vector<1x32xi32>
    %98 = arith.muli %97, %96 : vector<1x32xi32>
    %99 = arith.subi %3, %98 : vector<1x32xi32>
    %100 = vector.broadcast %32 : vector<48x1xi32> to vector<48x32xi32>
    %101 = vector.broadcast %99 : vector<1x32xi32> to vector<48x32xi32>
    %102 = arith.cmpi eq, %100, %101 : vector<48x32xi32>
    %103 = vector.broadcast %35 : vector<48x1xi32> to vector<48x32xi32>
    %104 = vector.broadcast %96 : vector<1x32xi32> to vector<48x32xi32>
    %105 = arith.cmpi eq, %103, %104 : vector<48x32xi32>
    %106 = arith.andi %102, %105 : vector<48x32xi1>
    %cst = arith.constant 1.000000e+00 : f32
    %cst_18 = arith.constant 0.000000e+00 : f32
    %107 = vector.broadcast %cst : f32 to vector<48x32xf32>
    %108 = vector.broadcast %cst_18 : f32 to vector<48x32xf32>
    %109 = arith.select %106, %107, %108 : vector<48x32xi1>, vector<48x32xf32>
    %110 = arith.truncf %109 : vector<48x32xf32> to vector<48x32xbf16>
    %111 = vector.broadcast %83 : vector<32x1xi32> to vector<32x48xi32>
    %112 = vector.broadcast %64 : vector<1x48xi32> to vector<32x48xi32>
    %113 = arith.cmpi eq, %111, %112 : vector<32x48xi32>
    %114 = vector.broadcast %80 : vector<32x1xi32> to vector<32x48xi32>
    %115 = vector.broadcast %67 : vector<1x48xi32> to vector<32x48xi32>
    %116 = arith.cmpi eq, %114, %115 : vector<32x48xi32>
    %117 = arith.andi %113, %116 : vector<32x48xi1>
    %cst_19 = arith.constant 1.000000e+00 : f32
    %cst_20 = arith.constant 0.000000e+00 : f32
    %118 = vector.broadcast %cst_19 : f32 to vector<32x48xf32>
    %119 = vector.broadcast %cst_20 : f32 to vector<32x48xf32>
    %120 = arith.select %117, %118, %119 : vector<32x48xi1>, vector<32x48xf32>
    %121 = arith.truncf %120 : vector<32x48xf32> to vector<32x48xbf16>
    %122 = vector.broadcast %32 : vector<48x1xi32> to vector<48x48xi32>
    %123 = vector.broadcast %64 : vector<1x48xi32> to vector<48x48xi32>
    %124 = arith.cmpi eq, %122, %123 : vector<48x48xi32>
    %125 = tpu.iota {dimensions = array<i32: 1>} : vector<1x32xi32>
    %c0 = arith.constant 0 : index
    %c0_21 = arith.constant 0 : index
    %126 = vector.load %arg3[%c0, %c0_21] : memref<8x32xf32, #tpu.memory_space<vmem>>, vector<8x32xf32>
    %127 = vector.extract_strided_slice %126 {offsets = [0, 0], sizes = [1, 32], strides = [1, 1]} : vector<8x32xf32> to vector<1x32xf32>
    %128 = vector.extract_strided_slice %126 {offsets = [1, 0], sizes = [1, 32], strides = [1, 1]} : vector<8x32xf32> to vector<1x32xf32>
    %129 = vector.extract_strided_slice %126 {offsets = [2, 0], sizes = [1, 32], strides = [1, 1]} : vector<8x32xf32> to vector<1x32xf32>
    %130 = vector.extract_strided_slice %126 {offsets = [3, 0], sizes = [1, 32], strides = [1, 1]} : vector<8x32xf32> to vector<1x32xf32>
    %131 = vector.extract_strided_slice %126 {offsets = [4, 0], sizes = [1, 32], strides = [1, 1]} : vector<8x32xf32> to vector<1x32xf32>
    %132 = vector.extract_strided_slice %126 {offsets = [5, 0], sizes = [1, 32], strides = [1, 1]} : vector<8x32xf32> to vector<1x32xf32>
    %133 = vector.extract_strided_slice %126 {offsets = [6, 0], sizes = [1, 32], strides = [1, 1]} : vector<8x32xf32> to vector<1x32xf32>
    %134 = vector.extract_strided_slice %126 {offsets = [7, 0], sizes = [1, 32], strides = [1, 1]} : vector<8x32xf32> to vector<1x32xf32>
    %c0_22 = arith.constant 0 : index
    %c0_23 = arith.constant 0 : index
    %135 = vector.load %arg1[%c0_22, %c0_23] : memref<32x32xf32, #tpu.memory_space<vmem>>, vector<32x32xf32>
    %136 = arith.truncf %135 : vector<32x32xf32> to vector<32x32xbf16>
    %cst_24 = arith.constant dense<0.000000e+00> : vector<48x32xf32>
    %137 = tpu.matmul %110, %136, %cst_24 {dimension_numbers = #tpu.dot_dimension_numbers<[1], [0], [0], [1], [0, 0, 1, 1], [], []>} : vector<48x32xbf16>, vector<32x32xbf16>, vector<48x32xf32> -> vector<48x32xf32>
    %138 = arith.truncf %137 : vector<48x32xf32> to vector<48x32xbf16>
    %c0_25 = arith.constant 0 : index
    %c0_26 = arith.constant 0 : index
    %c0_27 = arith.constant 0 : index
    %139 = vector.load %arg2[%c0_25, %c0_26, %c0_27] : memref<4x32x32xbf16, #tpu.memory_space<vmem>>, vector<1x32x32xbf16>
    %140 = vector.shape_cast %139 : vector<1x32x32xbf16> to vector<32x32xbf16>
    %cst_28 = arith.constant dense<0.000000e+00> : vector<48x32xf32>
    %141 = tpu.matmul %138, %140, %cst_28 {dimension_numbers = #tpu.dot_dimension_numbers<[1], [0], [0], [1], [0, 0, 1, 1], [], []>} : vector<48x32xbf16>, vector<32x32xbf16>, vector<48x32xf32> -> vector<48x32xf32>
    %142 = vector.broadcast %127 : vector<1x32xf32> to vector<48x32xf32>
    %143 = arith.addf %141, %142 : vector<48x32xf32>
    %c1 = arith.constant 1 : index
    %c0_29 = arith.constant 0 : index
    %c0_30 = arith.constant 0 : index
    %144 = vector.load %arg2[%c1, %c0_29, %c0_30] : memref<4x32x32xbf16, #tpu.memory_space<vmem>>, vector<1x32x32xbf16>
    %145 = vector.shape_cast %144 : vector<1x32x32xbf16> to vector<32x32xbf16>
    %cst_31 = arith.constant dense<0.000000e+00> : vector<48x32xf32>
    %146 = tpu.matmul %138, %145, %cst_31 {dimension_numbers = #tpu.dot_dimension_numbers<[1], [0], [0], [1], [0, 0, 1, 1], [], []>} : vector<48x32xbf16>, vector<32x32xbf16>, vector<48x32xf32> -> vector<48x32xf32>
    %147 = vector.broadcast %128 : vector<1x32xf32> to vector<48x32xf32>
    %148 = arith.addf %146, %147 : vector<48x32xf32>
    %c2 = arith.constant 2 : index
    %c0_32 = arith.constant 0 : index
    %c0_33 = arith.constant 0 : index
    %149 = vector.load %arg2[%c2, %c0_32, %c0_33] : memref<4x32x32xbf16, #tpu.memory_space<vmem>>, vector<1x32x32xbf16>
    %150 = vector.shape_cast %149 : vector<1x32x32xbf16> to vector<32x32xbf16>
    %cst_34 = arith.constant dense<0.000000e+00> : vector<48x32xf32>
    %151 = tpu.matmul %138, %150, %cst_34 {dimension_numbers = #tpu.dot_dimension_numbers<[1], [0], [0], [1], [0, 0, 1, 1], [], []>} : vector<48x32xbf16>, vector<32x32xbf16>, vector<48x32xf32> -> vector<48x32xf32>
    %152 = vector.broadcast %129 : vector<1x32xf32> to vector<48x32xf32>
    %153 = arith.addf %151, %152 : vector<48x32xf32>
    %154 = arith.truncf %148 : vector<48x32xf32> to vector<48x32xbf16>
    %cst_35 = arith.constant 0.000000e+00 : f32
    %155 = vector.broadcast %cst_35 : f32 to vector<48x32xf32>
    %c0_i32_36 = arith.constant 0 : i32
    %156 = vector.broadcast %c0_i32_36 : i32 to vector<1x32xi32>
    %157 = arith.cmpi sge, %125, %156 : vector<1x32xi32>
    %c16_i32_37 = arith.constant 16 : i32
    %158 = vector.broadcast %c16_i32_37 : i32 to vector<1x32xi32>
    %159 = arith.cmpi slt, %125, %158 : vector<1x32xi32>
    %160 = arith.andi %157, %159 : vector<1x32xi1>
    %161 = arith.extui %160 : vector<1x32xi1> to vector<1x32xi32>
    %162 = arith.sitofp %161 : vector<1x32xi32> to vector<1x32xf32>
    %163 = vector.broadcast %162 : vector<1x32xf32> to vector<48x32xf32>
    %164 = arith.mulf %143, %163 : vector<48x32xf32>
    %165 = arith.truncf %164 : vector<48x32xf32> to vector<48x32xbf16>
    %166 = vector.broadcast %162 : vector<1x32xf32> to vector<48x32xf32>
    %167 = arith.mulf %153, %166 : vector<48x32xf32>
    %168 = arith.truncf %167 : vector<48x32xf32> to vector<48x32xbf16>
    "tpu.trace_start"() <{level = 10 : i32, message = "qd,kd->qk"}> : () -> ()
    %cst_38 = arith.constant dense<0.000000e+00> : vector<48x48xf32>
    %169 = tpu.matmul %165, %154, %cst_38 {dimension_numbers = #tpu.dot_dimension_numbers<[1], [1], [0], [0], [0, 0, 1, 0], [], []>} : vector<48x32xbf16>, vector<48x32xbf16>, vector<48x48xf32> -> vector<48x48xf32>
    "tpu.trace_stop"() : () -> ()
    %cst_39 = arith.constant 2.500000e-01 : f32
    %170 = vector.broadcast %cst_39 : f32 to vector<48x48xf32>
    %171 = arith.mulf %169, %170 : vector<48x48xf32>
    %cst_40 = arith.constant -1.000000e+30 : f32
    %172 = vector.broadcast %cst_40 : f32 to vector<48x48xf32>
    %173 = arith.select %124, %171, %172 : vector<48x48xi1>, vector<48x48xf32>
    %cst_41 = arith.constant dense<0xFF800000> : vector<48xf32>
    %174 = vector.multi_reduction <maximumf>, %173, %cst_41 [1] : vector<48x48xf32> to vector<48xf32>
    %175 = vector.shape_cast %174 : vector<48xf32> to vector<48x1xf32>
    %176 = vector.broadcast %175 : vector<48x1xf32> to vector<48x48xf32>
    %177 = arith.subf %173, %176 : vector<48x48xf32>
    %178 = math.exp %177 : vector<48x48xf32>
    %cst_42 = arith.constant dense<0.000000e+00> : vector<48xf32>
    %179 = vector.multi_reduction <add>, %178, %cst_42 [1] : vector<48x48xf32> to vector<48xf32>
    %180 = vector.shape_cast %179 : vector<48xf32> to vector<48x1xf32>
    %181 = vector.broadcast %180 : vector<48x1xf32> to vector<48x48xf32>
    %182 = arith.divf %178, %181 : vector<48x48xf32>
    %183 = arith.truncf %182 : vector<48x48xf32> to vector<48x48xbf16>
    %cst_43 = arith.constant dense<0.000000e+00> : vector<48x32xf32>
    %184 = tpu.matmul %183, %168, %cst_43 {dimension_numbers = #tpu.dot_dimension_numbers<[1], [0], [0], [1], [0, 0, 1, 1], [], []>} : vector<48x48xbf16>, vector<48x32xbf16>, vector<48x32xf32> -> vector<48x32xf32>
    %185 = arith.addf %155, %184 : vector<48x32xf32>
    %c16_i32_44 = arith.constant 16 : i32
    %186 = vector.broadcast %c16_i32_44 : i32 to vector<1x32xi32>
    %187 = arith.cmpi sge, %125, %186 : vector<1x32xi32>
    %c32_i32 = arith.constant 32 : i32
    %188 = vector.broadcast %c32_i32 : i32 to vector<1x32xi32>
    %189 = arith.cmpi slt, %125, %188 : vector<1x32xi32>
    %190 = arith.andi %187, %189 : vector<1x32xi1>
    %191 = arith.extui %190 : vector<1x32xi1> to vector<1x32xi32>
    %192 = arith.sitofp %191 : vector<1x32xi32> to vector<1x32xf32>
    %193 = vector.broadcast %192 : vector<1x32xf32> to vector<48x32xf32>
    %194 = arith.mulf %143, %193 : vector<48x32xf32>
    %195 = arith.truncf %194 : vector<48x32xf32> to vector<48x32xbf16>
    %196 = vector.broadcast %192 : vector<1x32xf32> to vector<48x32xf32>
    %197 = arith.mulf %153, %196 : vector<48x32xf32>
    %198 = arith.truncf %197 : vector<48x32xf32> to vector<48x32xbf16>
    "tpu.trace_start"() <{level = 10 : i32, message = "qd,kd->qk"}> : () -> ()
    %cst_45 = arith.constant dense<0.000000e+00> : vector<48x48xf32>
    %199 = tpu.matmul %195, %154, %cst_45 {dimension_numbers = #tpu.dot_dimension_numbers<[1], [1], [0], [0], [0, 0, 1, 0], [], []>} : vector<48x32xbf16>, vector<48x32xbf16>, vector<48x48xf32> -> vector<48x48xf32>
    "tpu.trace_stop"() : () -> ()
    %cst_46 = arith.constant 2.500000e-01 : f32
    %200 = vector.broadcast %cst_46 : f32 to vector<48x48xf32>
    %201 = arith.mulf %199, %200 : vector<48x48xf32>
    %cst_47 = arith.constant -1.000000e+30 : f32
    %202 = vector.broadcast %cst_47 : f32 to vector<48x48xf32>
    %203 = arith.select %124, %201, %202 : vector<48x48xi1>, vector<48x48xf32>
    %cst_48 = arith.constant dense<0xFF800000> : vector<48xf32>
    %204 = vector.multi_reduction <maximumf>, %203, %cst_48 [1] : vector<48x48xf32> to vector<48xf32>
    %205 = vector.shape_cast %204 : vector<48xf32> to vector<48x1xf32>
    %206 = vector.broadcast %205 : vector<48x1xf32> to vector<48x48xf32>
    %207 = arith.subf %203, %206 : vector<48x48xf32>
    %208 = math.exp %207 : vector<48x48xf32>
    %cst_49 = arith.constant dense<0.000000e+00> : vector<48xf32>
    %209 = vector.multi_reduction <add>, %208, %cst_49 [1] : vector<48x48xf32> to vector<48xf32>
    %210 = vector.shape_cast %209 : vector<48xf32> to vector<48x1xf32>
    %211 = vector.broadcast %210 : vector<48x1xf32> to vector<48x48xf32>
    %212 = arith.divf %208, %211 : vector<48x48xf32>
    %213 = arith.truncf %212 : vector<48x48xf32> to vector<48x48xbf16>
    %cst_50 = arith.constant dense<0.000000e+00> : vector<48x32xf32>
    %214 = tpu.matmul %213, %198, %cst_50 {dimension_numbers = #tpu.dot_dimension_numbers<[1], [0], [0], [1], [0, 0, 1, 1], [], []>} : vector<48x48xbf16>, vector<48x32xbf16>, vector<48x32xf32> -> vector<48x32xf32>
    %215 = arith.addf %185, %214 : vector<48x32xf32>
    %216 = arith.truncf %215 : vector<48x32xf32> to vector<48x32xbf16>
    %c3 = arith.constant 3 : index
    %c0_51 = arith.constant 0 : index
    %c0_52 = arith.constant 0 : index
    %217 = vector.load %arg2[%c3, %c0_51, %c0_52] : memref<4x32x32xbf16, #tpu.memory_space<vmem>>, vector<1x32x32xbf16>
    %218 = vector.shape_cast %217 : vector<1x32x32xbf16> to vector<32x32xbf16>
    %cst_53 = arith.constant dense<0.000000e+00> : vector<48x32xf32>
    %219 = tpu.matmul %216, %218, %cst_53 {dimension_numbers = #tpu.dot_dimension_numbers<[1], [0], [0], [1], [0, 0, 1, 1], [], []>} : vector<48x32xbf16>, vector<32x32xbf16>, vector<48x32xf32> -> vector<48x32xf32>
    %220 = vector.broadcast %130 : vector<1x32xf32> to vector<48x32xf32>
    %221 = arith.addf %219, %220 : vector<48x32xf32>
    %222 = arith.truncf %221 : vector<48x32xf32> to vector<48x32xbf16>
    %cst_54 = arith.constant dense<0.000000e+00> : vector<32x32xf32>
    %223 = tpu.matmul %121, %222, %cst_54 {dimension_numbers = #tpu.dot_dimension_numbers<[1], [0], [0], [1], [0, 0, 1, 1], [], []>} : vector<32x48xbf16>, vector<48x32xbf16>, vector<32x32xf32> -> vector<32x32xf32>
    %224 = arith.addf %135, %223 : vector<32x32xf32>
    %cst_55 = arith.constant dense<0.000000e+00> : vector<32xf32>
    %225 = vector.multi_reduction <add>, %224, %cst_55 [1] : vector<32x32xf32> to vector<32xf32>
    %226 = vector.shape_cast %225 : vector<32xf32> to vector<32x1xf32>
    %cst_56 = arith.constant 3.200000e+01 : f32
    %227 = vector.broadcast %cst_56 : f32 to vector<32x1xf32>
    %228 = arith.divf %226, %227 : vector<32x1xf32>
    %229 = vector.broadcast %228 : vector<32x1xf32> to vector<32x32xf32>
    %230 = arith.subf %224, %229 : vector<32x32xf32>
    %231 = arith.mulf %230, %230 : vector<32x32xf32>
    %cst_57 = arith.constant dense<0.000000e+00> : vector<32xf32>
    %232 = vector.multi_reduction <add>, %231, %cst_57 [1] : vector<32x32xf32> to vector<32xf32>
    %233 = vector.shape_cast %232 : vector<32xf32> to vector<32x1xf32>
    %cst_58 = arith.constant 3.200000e+01 : f32
    %234 = vector.broadcast %cst_58 : f32 to vector<32x1xf32>
    %235 = arith.divf %233, %234 : vector<32x1xf32>
    %236 = vector.broadcast %228 : vector<32x1xf32> to vector<32x32xf32>
    %237 = arith.subf %224, %236 : vector<32x32xf32>
    %cst_59 = arith.constant 9.99999974E-6 : f32
    %238 = vector.broadcast %cst_59 : f32 to vector<32x1xf32>
    %239 = arith.addf %235, %238 : vector<32x1xf32>
    %240 = math.rsqrt %239 : vector<32x1xf32>
    %241 = vector.broadcast %240 : vector<32x1xf32> to vector<32x32xf32>
    %242 = arith.mulf %237, %241 : vector<32x32xf32>
    %243 = vector.broadcast %131 : vector<1x32xf32> to vector<32x32xf32>
    %244 = arith.mulf %242, %243 : vector<32x32xf32>
    %245 = vector.broadcast %132 : vector<1x32xf32> to vector<32x32xf32>
    %246 = arith.addf %244, %245 : vector<32x32xf32>
    %c0_60 = arith.constant 0 : index
    %c0_61 = arith.constant 0 : index
    %247 = vector.load %arg6[%c0_60, %c0_61] : memref<160x1xf32, #tpu.memory_space<vmem>>, vector<128x1xf32>
    %c128 = arith.constant 128 : index
    %c0_62 = arith.constant 0 : index
    %248 = vector.load %arg6[%c128, %c0_62] : memref<160x1xf32, #tpu.memory_space<vmem>>, vector<32x1xf32>
    %c0_63 = arith.constant 0 : index
    %c0_64 = arith.constant 0 : index
    %249 = vector.load %arg4[%c0_63, %c0_64] : memref<128x32xbf16, #tpu.memory_space<vmem>>, vector<128x32xbf16>
    %250 = arith.truncf %246 : vector<32x32xf32> to vector<32x32xbf16>
    %cst_65 = arith.constant dense<0.000000e+00> : vector<128x32xf32>
    %251 = tpu.matmul %249, %250, %cst_65 {dimension_numbers = #tpu.dot_dimension_numbers<[1], [0], [0], [1], [0, 0, 1, 1], [], []>} : vector<128x32xbf16>, vector<32x32xbf16>, vector<128x32xf32> -> vector<128x32xf32>
    %252 = vector.broadcast %247 : vector<128x1xf32> to vector<128x32xf32>
    %253 = arith.addf %251, %252 : vector<128x32xf32>
    %cst_66 = arith.constant 0.000000e+00 : f32
    %254 = vector.broadcast %cst_66 : f32 to vector<128x32xf32>
    %255 = arith.maximumf %253, %254 : vector<128x32xf32>
    %c0_67 = arith.constant 0 : index
    %c0_68 = arith.constant 0 : index
    %256 = vector.load %arg5[%c0_67, %c0_68] : memref<32x128xbf16, #tpu.memory_space<vmem>>, vector<32x128xbf16>
    %257 = arith.truncf %255 : vector<128x32xf32> to vector<128x32xbf16>
    %cst_69 = arith.constant dense<0.000000e+00> : vector<32x32xf32>
    %258 = tpu.matmul %256, %257, %cst_69 {dimension_numbers = #tpu.dot_dimension_numbers<[1], [0], [0], [1], [0, 0, 1, 1], [], []>} : vector<32x128xbf16>, vector<128x32xbf16>, vector<32x32xf32> -> vector<32x32xf32>
    %259 = vector.broadcast %248 : vector<32x1xf32> to vector<32x32xf32>
    %260 = arith.addf %258, %259 : vector<32x32xf32>
    %261 = arith.addf %246, %260 : vector<32x32xf32>
    %cst_70 = arith.constant dense<0.000000e+00> : vector<32xf32>
    %262 = vector.multi_reduction <add>, %261, %cst_70 [1] : vector<32x32xf32> to vector<32xf32>
    %263 = vector.shape_cast %262 : vector<32xf32> to vector<32x1xf32>
    %cst_71 = arith.constant 3.200000e+01 : f32
    %264 = vector.broadcast %cst_71 : f32 to vector<32x1xf32>
    %265 = arith.divf %263, %264 : vector<32x1xf32>
    %266 = vector.broadcast %265 : vector<32x1xf32> to vector<32x32xf32>
    %267 = arith.subf %261, %266 : vector<32x32xf32>
    %268 = arith.mulf %267, %267 : vector<32x32xf32>
    %cst_72 = arith.constant dense<0.000000e+00> : vector<32xf32>
    %269 = vector.multi_reduction <add>, %268, %cst_72 [1] : vector<32x32xf32> to vector<32xf32>
    %270 = vector.shape_cast %269 : vector<32xf32> to vector<32x1xf32>
    %cst_73 = arith.constant 3.200000e+01 : f32
    %271 = vector.broadcast %cst_73 : f32 to vector<32x1xf32>
    %272 = arith.divf %270, %271 : vector<32x1xf32>
    %273 = vector.broadcast %265 : vector<32x1xf32> to vector<32x32xf32>
    %274 = arith.subf %261, %273 : vector<32x32xf32>
    %cst_74 = arith.constant 9.99999974E-6 : f32
    %275 = vector.broadcast %cst_74 : f32 to vector<32x1xf32>
    %276 = arith.addf %272, %275 : vector<32x1xf32>
    %277 = math.rsqrt %276 : vector<32x1xf32>
    %278 = vector.broadcast %277 : vector<32x1xf32> to vector<32x32xf32>
    %279 = arith.mulf %274, %278 : vector<32x32xf32>
    %280 = vector.broadcast %133 : vector<1x32xf32> to vector<32x32xf32>
    %281 = arith.mulf %279, %280 : vector<32x32xf32>
    %282 = vector.broadcast %134 : vector<1x32xf32> to vector<32x32xf32>
    %283 = arith.addf %281, %282 : vector<32x32xf32>
    %c0_75 = arith.constant 0 : index
    %c0_76 = arith.constant 0 : index
    %284 = vector.load %arg7[%c0_75, %c0_76] : memref<32x32xf32, #tpu.memory_space<vmem>>, vector<32x32xf32>
    tpu.vector_store %arg7[%c0_75, %c0_76], %283 {strides = array<i32>} : memref<32x32xf32, #tpu.memory_space<vmem>>, vector<32x32xf32>,
    return
  }
  func.func @transform_0(%arg0: i32) -> (i32, i32) {
    %c0_i32 = arith.constant 0 : i32
    %c0_i32_0 = arith.constant 0 : i32
    return %arg0, %c0_i32 : i32, i32
  }
  func.func @transform_1(%arg0: i32) -> (i32, i32, i32) {
    %c0_i32 = arith.constant 0 : i32
    %c0_i32_0 = arith.constant 0 : i32
    %c0_i32_1 = arith.constant 0 : i32
    %c0_i32_2 = arith.constant 0 : i32
    return %c0_i32, %c0_i32_0, %c0_i32_1 : i32, i32, i32
  }
  func.func @transform_2(%arg0: i32) -> (i32, i32) {
    %c0_i32 = arith.constant 0 : i32
    %c0_i32_0 = arith.constant 0 : i32
    %c0_i32_1 = arith.constant 0 : i32
    return %c0_i32, %c0_i32_0 : i32, i32
  }
  func.func @transform_3(%arg0: i32) -> (i32, i32) {
    %c0_i32 = arith.constant 0 : i32
    %c0_i32_0 = arith.constant 0 : i32
    %c0_i32_1 = arith.constant 0 : i32
    return %c0_i32, %c0_i32_0 : i32, i32
  }
  func.func @transform_4(%arg0: i32) -> (i32, i32) {
    %c0_i32 = arith.constant 0 : i32
    %c0_i32_0 = arith.constant 0 : i32
    %c0_i32_1 = arith.constant 0 : i32
    return %c0_i32, %c0_i32_0 : i32, i32
  }
  func.func @transform_5(%arg0: i32) -> (i32, i32) {
    %c0_i32 = arith.constant 0 : i32
    %c0_i32_0 = arith.constant 0 : i32
    %c0_i32_1 = arith.constant 0 : i32
    return %c0_i32, %c0_i32_0 : i32, i32
  }
  func.func @transform_6(%arg0: i32) -> (i32, i32) {
    %c0_i32 = arith.constant 0 : i32
    %c0_i32_0 = arith.constant 0 : i32
    return %arg0, %c0_i32 : i32, i32
  }
}

</mosaic_0001>

<bundles_post_ra>
// kernel: bhcgsam_forward.1
= control target key start
LH: loop header
LB: loop body
LE: loop exit
PB: predicated region body
PF: predicated region fallthrough
CT: control target
= control target key end

     0   :  { %11 = vsyncpa [#allocation3], 0  ;;  %s3360_s0 = inlined_call_operand.vmem [shape: f32[64,32], index: 0, kind: input, shape index: {}]   ;;  %s3361_s1 = inlined_call_operand.vmem [shape: bf16[4,32,32], index: 1, kind: input, shape index: {}]   ;;  %s3362_s2 = inlined_call_operand.vmem [shape: f32[8,32], index: 2, kind: input, shape index: {}]   ;;  %s3363_s3 = inlined_call_operand.vmem [shape: bf16[128,32], index: 3, kind: input, shape index: {}]   ;;  %s3364_s4 = inlined_call_operand.vmem [shape: bf16[32,128], index: 4, kind: input, shape index: {}]   ;;  %s3365_s5 = inlined_call_operand.vmem [shape: f32[160,1], index: 5, kind: input, shape index: {}]   ;;  %s3366_s6 = inlined_call_operand.hbm [shape: f32[64,32], index: 6, kind: output, shape index: {}]  }
   0x1   :  { %13 = vsyncpa [#allocation3 + $0x1], 0  ;;  %s2673_s21 = smov 0   ;;  %s2675_s22 = smov 0  }
   0x2   :  { %s2677_s23 = smov 0   ;;  %s2679_s24 = smov 0  }
   0x3 LB: > { %s2694_s25 = sadd.s32 4294967295, %s2630_s24   ;;  %s2072_s26 = sadd.s32 4294967294, %s2630_s24   ;;  %s2630_s24 = sphi %s2679_s24, %s3372_s24   ;;  %s2626_s23 = sphi %s2677_s23, %s3371_s23   ;;  %s2622_s22 = sphi %s2675_s22, %s3370_s22   ;;  %s2618_s21 = sphi %s2673_s21, %s3369_s21  }
   0x4   : > { %s2698_s27 = sadd.s32 1, %s2630_s24   ;;  %s157_s28 = sadd.s32 1, %s2626_s23 }
   0x5   : > { %s154_s29 = ssub.s32 %s2630_s24, %s2698_s27  ;;  %p167_p0 = scmp.ne.s32.totalorder %s2626_s23, %s2622_s22 }
   0x6   : > { %p155_p1 = scmp.eq.s32.totalorder %s154_s29, 0  ;;  %p168_p2 = scmp.eq.s32.totalorder %s2694_s25, 1 }
   0x7   : > { %p173_p3 = scmp.ne.s32.totalorder %s2622_s22, %s2618_s21  ;;  %p174_p4 = scmp.eq.s32.totalorder %s2072_s26, 1 }
   0x8   : > { %s2709_s30 = scalar_select %p155_p1, %s2626_s23, %s157_s28  }
   0x9   : > { %p2711_p5 = por %p168_p2, %p167_p0  ;;  %p2715_p6 = por %p174_p4, %p173_p3 }
   0xa   : > { %p2075_p7 = scmp.ge.s32.totalorder %s2630_s24, 1  ;;  %p216_p8 = scmp.lt.s32.totalorder %s2630_s24, 3 }
   0xc   : > { %p217_p9 = pnand %p2075_p7, %p216_p8 }
   0xd   : > { %s2077_s9 = sshll.u32 (!%p217_p9), %s2694_s25, 2  ;;  %s243_s19 = sand.u32 (!%p217_p9), 1, %s2622_s22  }
   0xe   : > { %220 = sbr.rel (%p217_p9) target bundleno = 2741 (0xab5), region = 44  ;;  %p247_p10 = scmp.lt.s32.totalorder (!%p217_p9), %s2077_s9, 7 }
   0xf   : > { %s2076_s20 = sshll.u32 (!%p217_p9), %s243_s19, 5  ;;  %s2160_s28 = sshll.u32 (!%p217_p9), %s2694_s25, 9 }
  0x10   : > { %s245_s26 = scalar_lea.vmem (!%p217_p9), [#allocation2], %s2076_s20  ;;  %s3314_s11 = scalar_lea.hbm (!%p217_p9), %s3366_s6, %s2160_s28 }
  0x11   : > { %s2010_s29 = sshll.u32 (!%p217_p9), %s245_s26, 4  ;;  %s3320_s25 = scalar_lea.sflag (!%p217_p9), [#allocation3], %s243_s19  ;;  %s3316_s29 = int_to_ptr.vmem [resolvable:$true] %s2010_s29 }
  0x12   : > { %s2570_s12 = scalar_lea.vmem (!%p217_p9), %s3316_s29, 512  ;;  %s2635_s14 = smov (!%p217_p9), [#allocation2]  }
  0x13   : > { %v254_v0 = vlaneseq  ;;  %v2632_v1 = vmov 0.0   ;;  %vm2633_vm0 = vmmov 0   ;;  %s3374_s9 = smov (!%p247_p10, %s2077_s9), 7  ;;  %v2634_v4 = vmov 0   ;;  %v2483_v56 = vld [vmem:[%s3361_s1 + $0x18] sm:$0xff]   ;;  %p2571_p11 = scmp.ne.s32.totalorder %s3316_s29, %s2570_s12 }
  0x14   : > { %2235 = vmatprep.subr.bf16.mxu0 %v2632_v1  ;;  %2239 = vmatprep.mubr.msk.bf16.mxu0 %vm2633_vm0, %v2632_v1  ;;  %s2078_s10 = sshll.u32 %s3374_s9, 3  ;;  %s2574_s15 = sshll.u32 %s2635_s14, 4  ;;  %s2575_s15 = int_to_ptr.vmem [resolvable:$false] %s2574_s15 }
  0x15   : > { %v2725_v2 = vshrl.u32 %v254_v0, 7  ;;  %v2727_v3 = vand.u32 127, %v254_v0  ;;  %2251 = vmatprep.subr.bf16.mxu1 %v2632_v1  ;;  %2255 = vmatprep.mubr.msk.bf16.mxu1 %vm2633_vm0, %v2632_v1  ;;  %s2749_s13 = scalar_lea.vmem %s3360_s0, %s2078_s10  ;;  %p2572_p12 = pnand %p2571_p11, %p2711_p5 }
  0x16   : > { %2482 = vset.pattern.permute.xlu1 %v2634_v4  ;;  %2481 = vset.pattern.permute.xlu0 %v2634_v4  ;;  %v511_v12 = vld [vmem:[%s2749_s13 + $0x10] sm:$0xff]  ;;  %v512_v13 = vld [vmem:[%s2749_s13 + $0x18] sm:$0xff]  ;;  %v509_v14 = vld [vmem:[%s2749_s13] sm:$0xff]  ;;  %s2576_s16 = scalar_lea.vmem %s2575_s15, 1024  ;;  %p2577_p0 = scmp.lt.s32.totalorder %s3316_s29, %s2575_s15 }
  0x17   : > { %v2735_v5 = vadd.s32 8, %v2725_v2  ;;  %vm263_vm1 = vcmp.ge.s32.totalorder %v2725_v2, 6  ;;  %vm395_vm2 = vcmp.ge.s32.totalorder %v2727_v3, 6  ;;  %vm397_vm3 = vcmp.ge.s32.totalorder %v2727_v3, 12  ;;  %v510_v17 = vld [vmem:[%s2749_s13 + $0x8] sm:$0xff]  ;;  %p2573_p13 = pneg %p2572_p12  ;;  %p2578_p1 = scmp.lt.s32.totalorder %s2576_s16, %s2570_s12 }
  0x18   : > { %v2741_v6 = vsel %vm263_vm1, 1, %v2634_v4  ;;  %v396_v7 = vsel %vm395_vm2, 1, %v2634_v4  ;;  %v398_v8 = vsel %vm397_vm3, 1, %v2634_v4  ;;  %vm400_vm4 = vcmp.ge.s32.totalorder %v2727_v3, 18 }
  0x19   : > { %vm276_vm5 = vcmp.ge.s32.totalorder %v2735_v5, 12  ;;  %v383_v9 = vmul.u32 6, %v2741_v6  ;;  %v399_v10 = vadd.s32 %v398_v8, %v396_v7  ;;  %v401_v11 = vsel %vm400_vm4, 1, %v2634_v4  ;;  %p2579_p2 = por %p2578_p1, %p2577_p0 }
  0x1a   : > { %v282_v15 = vsel %vm276_vm5, 1, %v2634_v4  ;;  %vm403_vm6 = vcmp.ge.s32.totalorder %v2727_v3, 24  ;;  %vm406_vm7 = vcmp.ge.s32.totalorder %v2727_v3, 30  ;;  %v514_v16 = vpack.c.bf16 %v512_v13, %v511_v12 }
  0x1b   : > { %v2761_v18 = vadd.s32 1, %v282_v15  ;;  %v402_v19 = vadd.s32 %v401_v11, %v399_v10  ;;  %v404_v20 = vsel %vm403_vm6, 1, %v2634_v4  ;;  %v407_v21 = vsel %vm406_vm7, 1, %v2634_v4  ;;  %v2485_v10 = vld [vmem:[%s3361_s1] sm:$0xff]   ;;  %v2486_v11 = vld [vmem:[%s3361_s1 + $0x10] sm:$0xff]   ;;  %p2580_p3 = pnand %p2579_p2, %p2573_p13 }
  0x1c   : > { %vm409_vm8 = vcmp.ge.s32.totalorder %v2727_v3, 36  ;;  %2236 = vmatpush3.bf16.msra.mxu0 %v514_v16  ;;  %v513_v22 = vpack.c.bf16 %v510_v17, %v509_v14  ;;  %vm412_vm9 = vcmp.ge.s32.totalorder %v2727_v3, 42  ;;  %vm449_vm10 = vcmp.ge.s32.totalorder %v2727_v3, 8  ;;  %v2487_v16 = vld [vmem:[%s3361_s1 + $0x28] sm:$0xff]  }
  0x1d   : > { %v384_v23 = vmul.u32 6, %v2761_v18  ;;  %v405_v24 = vadd.s32 %v404_v20, %v402_v19  ;;  %2237 = vmatprep.subr.bf16.mxu0 %v2632_v1  ;;  %v410_v25 = vsel %vm409_vm8, 1, %v2634_v4  ;;  %vm451_vm11 = vcmp.ge.s32.totalorder %v2727_v3, 16 }
  0x1e   : > { %v2773_v26 = vadd.s32 16, %v2725_v2  ;;  %v389_v27 = vsub.s32 %v2725_v2, %v383_v9  ;;  %v450_v29 = vsel %vm449_vm10, 1, %v2634_v4  ;;  %v452_v30 = vsel %vm451_vm11, 1, %v2634_v4  ;;  %v2484_v9 = vld [vmem:[%s3361_s1 + $0x8] sm:$0xff]  }
  0x1f   : > { %v408_v28 = vadd.s32 %v407_v21, %v405_v24  ;;  %v413_v31 = vsel %vm412_vm9, 1, %v2634_v4  ;;  %v453_v32 = vadd.s32 %v452_v30, %v450_v29  ;;  %v2782_v33 = vadd.s32 24, %v2725_v2  ;;  %2252 = vmatpush3.bf16.msra.mxu1 %v2484_v9 }
  0x20   : > { %vm295_vm12 = vcmp.ge.s32.totalorder %v2773_v26, 18  ;;  %2238 = vmatpush3.bf16.msra.mxu0 %v513_v22  ;;  %v259_v36 = vadd.s32 32, %v2725_v2  ;;  %v260_v37 = vadd.s32 40, %v2725_v2  ;;  %v390_v38 = vsub.s32 %v2735_v5, %v384_v23  ;;  %2253 = vmatprep.subr.bf16.mxu1 %v2632_v1 }
  0x21   : > { %v411_v34 = vadd.s32 %v410_v25, %v408_v28  ;;  %v301_v35 = vsel %vm295_vm12, 1, %v2634_v4  ;;  %v454_v39 = vadd.s32 %v453_v32, %v404_v20  ;;  %vm332_vm13 = vcmp.ge.s32.totalorder %v2782_v33, 30  ;;  %2267 = vmatprep.subr.bf16.mxu0 %v2632_v1  ;;  %v2488_v20 = vld [vmem:[%s3361_s1 + $0x20] sm:$0xff]  }
  0x22   : > { %v2789_v40 = vadd.s32 2, %v301_v35  ;;  %v338_v42 = vsel %vm332_vm13, 1, %v2634_v4  ;;  %vm351_vm14 = vcmp.ge.s32.totalorder %v259_v36, 36  ;;  %vm370_vm15 = vcmp.ge.s32.totalorder %v260_v37, 42 }
  0x23   : > { %v2793_v41 = vadd.s32 %v413_v31, %v411_v34  ;;  %v455_v43 = vmul.u32 8, %v454_v39  ;;  %v2796_v44 = vadd.s32 4, %v338_v42  ;;  %vm463_vm1 = vcmp.eq.s32.totalorder %v389_v27, %v454_v39  ;;  %2254 = vmatpush3.bf16.msra.mxu1 %v2485_v10 }
  0x24   : > { %v385_v45 = vmul.u32 6, %v2789_v40  ;;  %v357_v46 = vsel %vm351_vm14, 1, %v2634_v4  ;;  %v376_v47 = vsel %vm370_vm15, 1, %v2634_v4  ;;  %vm464_vm2 = vcmp.eq.s32.totalorder %v390_v38, %v454_v39  ;;  %2283 = vmatprep.subr.bf16.mxu1 %v2632_v1 }
  0x25   : > { %v456_v48 = vsub.s32 %v2727_v3, %v455_v43  ;;  %v386_v49 = vmul.u32 6, %v2796_v44  ;;  %v2803_v50 = vadd.s32 5, %v357_v46  ;;  %v2805_v51 = vadd.s32 6, %v376_v47 }
  0x26   : > { %v391_v52 = vsub.s32 %v2773_v26, %v385_v45  ;;  %vm515_vm12 = vcmask 261120  }
  0x27   : > { %vm457_vm3 = vcmp.eq.s32.totalorder %v2741_v6, %v456_v48  ;;  %vm458_vm4 = vcmp.eq.s32.totalorder %v2761_v18, %v456_v48  ;;  %v392_v53 = vsub.s32 %v2782_v33, %v386_v49  ;;  %vm459_vm5 = vcmp.eq.s32.totalorder %v2789_v40, %v456_v48 }
  0x28   : > { %vm469_vm6 = vmand %vm457_vm3, %vm463_vm1  ;;  %vm460_vm7 = vcmp.eq.s32.totalorder %v2796_v44, %v456_v48  ;;  %vm465_vm8 = vcmp.eq.s32.totalorder %v391_v52, %v454_v39  ;;  %v387_v54 = vmul.u32 6, %v2803_v50  ;;  %v388_v55 = vmul.u32 6, %v2805_v51 }
  0x29   : > { %vm470_vm9 = vmand %vm458_vm4, %vm464_vm2  ;;  %v475_v57 = vsel %vm469_vm6, 1.0, %v2632_v1  ;;  %vm466_vm10 = vcmp.eq.s32.totalorder %v392_v53, %v454_v39  ;;  %vm461_vm15 = vcmp.eq.s32.totalorder %v2803_v50, %v456_v48  ;;  %vm462_vm2 = vcmp.eq.s32.totalorder %v2805_v51, %v456_v48 }
  0x2a   : > { %v476_v58 = vsel %vm470_vm9, 1.0, %v2632_v1  ;;  %vm471_vm13 = vmand %vm459_vm5, %vm465_vm8  ;;  %v393_v60 = vsub.s32 %v259_v36, %v387_v54  ;;  %v394_v61 = vsub.s32 %v260_v37, %v388_v55  ;;  %v678_v53 = vsub.s32 1, %v2725_v2  ;;  %v2891_v54 = vld [vmem:[%s3362_s2] sm:$0xff] }
  0x2b   : > { %v481_v59 = vpack.c.bf16 %v476_v58, %v475_v57  ;;  %vm472_vm14 = vmand %vm460_vm7, %vm466_vm10  ;;  %v477_v62 = vsel %vm471_vm13, 1.0, %v2632_v1  ;;  %vm1010_vm6 = vcmp.lt.s32.totalorder %v2727_v3, 32  ;;  %vm831_vm7 = vcmp.lt.s32.totalorder %v2727_v3, 16 }
  0x2c   : > { %v478_v63 = vsel %vm472_vm14, 1.0, %v2632_v1  ;;  %vm467_vm1 = vcmp.eq.s32.totalorder %v393_v60, %v454_v39  ;;  %vm468_vm3 = vcmp.eq.s32.totalorder %v394_v61, %v454_v39  ;;  %vm1011_vm8 = vmand %vm451_vm11, %vm1010_vm6  ;;  %vm502_vm11 = vcmp.eq.s32.totalorder %v2741_v6, %v2793_v41 }
  0x2d   : > { %2240 = vmatmul.mubr.msk.bf16.vlgmr.msra.gmra.mxu0 %vm515_vm12, %v481_v59  ;;  %v482_v0 = vpack.c.bf16 %v478_v63, %v477_v62  ;;  %vm473_vm4 = vmand %vm461_vm15, %vm467_vm1  ;;  %v679_v59 = vrot.slane %v2891_v54, %v678_v53  ;;  %vm940_vm9 = vcmask 392192   ;;  %vm503_vm10 = vcmp.eq.s32.totalorder %v2761_v18, %v2793_v41 }
  0x2e   : > { %2243 = vmatprep.mubr.msk.bf16.mxu0 %vm2633_vm0, %v2632_v1  ;;  %2268 = vmatpush3.bf16.msra.mxu0 %v2483_v56  ;;  %vm474_vm5 = vmand %vm462_vm2, %vm468_vm3  ;;  %v479_v4 = vsel %vm473_vm4, 1.0, %v2632_v1  ;;  %vm504_vm13 = vcmp.eq.s32.totalorder %v2789_v40, %v2793_v41  ;;  %vm505_vm14 = vcmp.eq.s32.totalorder %v2796_v44, %v2793_v41  ;;  %vm506_vm15 = vcmp.eq.s32.totalorder %v2803_v50, %v2793_v41 }
  0x2f   : > { %2269 = vmatprep.subr.bf16.mxu0 %v2632_v1  ;;  %v480_v7 = vsel %vm474_vm5, 1.0, %v2632_v1  ;;  %vm507_vm1 = vcmp.eq.s32.totalorder %v2805_v51, %v2793_v41 }
  0x30   : > { %v483_v8 = vpack.c.bf16 %v480_v7, %v479_v4 }
  0x32   : > { %2270 = vmatpush3.bf16.msra.mxu0 %v2486_v11 }
  0x33   : > { %2299 = vmatprep.subr.bf16.mxu0 %v2632_v1 }
  0x35   : > { %2244 = vmatmul.mubr.msk.bf16.gmra.mxu0 %vm515_vm12, %v482_v0 }
  0x36   : > { %2247 = vmatprep.mubr.msk.bf16.mxu0 %vm2633_vm0, %v2632_v1 }
  0x3d   : > { %2248 = vmatmul.mubr.msk.bf16.gmra.mxu0 %vm515_vm12, %v483_v8 }
  0x3e   : > { %2271 = vmatprep.mubr.msk.bf16.mxu0 %vm2633_vm0, %v2632_v1 }
  0xed   : > { %v559_v12 = vpop.f32.mrf.mxu0 }
  0xef   : > { %v2241_v13 = vpop.f32.mrf.mxu0 }
  0xf1   : > { %v562_v14 = vpop.f32.mrf.mxu0 }
  0xf2   : > { %v582_v15 = vpack.c.bf16 %v562_v14, %v559_v12 }
  0xf3   : > { %v2242_v17 = vpop.f32.mrf.mxu0 }
  0xf4   : > { %2256 = vmatmul.mubr.msk.bf16.vlgmr.msra.gmra.mxu1 %vm515_vm12, %v582_v15  ;;  %2272 = vmatmul.mubr.msk.bf16.vlgmr.msra.gmra.mxu0 %vm515_vm12, %v582_v15 }
  0xf5   : > { %v567_v19 = vpop.f32.mrf.mxu0  ;;  %2259 = vmatprep.mubr.msk.bf16.mxu1 %vm2633_vm0, %v2632_v1  ;;  %2275 = vmatprep.mubr.msk.bf16.mxu0 %vm2633_vm0, %v2632_v1 }
  0xf6   : > { %2284 = vmatpush3.bf16.msra.mxu1 %v2487_v16  ;;  %v591_v16 = vsub.s32 0, %v2725_v2 }
  0xf7   : > { %v2245_v21 = vpop.f32.mrf.mxu0  ;;  %2285 = vmatprep.subr.bf16.mxu1 %v2632_v1 }
  0xf9   : > { %v570_v22 = vpop.f32.mrf.mxu0 }
  0xfa   : > { %v583_v23 = vpack.c.bf16 %v570_v22, %v567_v19  ;;  %2286 = vmatpush3.bf16.msra.mxu1 %v2488_v20 }
  0xfb   : > { %v2246_v24 = vpop.f32.mrf.mxu0  ;;  %2317 = vmatprep.subr.bf16.mxu1 %v2632_v1 }
  0xfc   : > { %2260 = vmatmul.mubr.msk.bf16.gmra.mxu1 %vm515_vm12, %v583_v23  ;;  %2276 = vmatmul.mubr.msk.bf16.gmra.mxu0 %vm515_vm12, %v583_v23 }
  0xfd   : > { %v575_v25 = vpop.f32.mrf.mxu0  ;;  %2263 = vmatprep.mubr.msk.bf16.mxu1 %vm2633_vm0, %v2632_v1  ;;  %2279 = vmatprep.mubr.msk.bf16.mxu0 %vm2633_vm0, %v2632_v1 }
  0xff   : > { %v2249_v27 = vpop.f32.mrf.mxu0 }
 0x100   : > { %v756_v27 = vsub.s32 2, %v2725_v2 }
 0x101   : > { %v578_v28 = vpop.f32.mrf.mxu0 }
 0x102   : > { %v584_v29 = vpack.c.bf16 %v578_v28, %v575_v25 }
 0x103   : > { %v2250_v30 = vpop.f32.mrf.mxu0 }
 0x104   : > { %2264 = vmatmul.mubr.msk.bf16.gmra.mxu1 %vm515_vm12, %v584_v29  ;;  %2280 = vmatmul.mubr.msk.bf16.gmra.mxu0 %vm515_vm12, %v584_v29 }
 0x105   : > { %2287 = vmatprep.mubr.msk.bf16.mxu1 %vm2633_vm0, %v2632_v1  ;;  %2305 = vmatprep.mubr.msk.bf16.mxu0 %vm2633_vm0, %v2632_v1 }
 0x10c   : > { %2288 = vmatmul.mubr.msk.bf16.vlgmr.msra.gmra.mxu1 %vm515_vm12, %v582_v15 }
 0x10d   : > { %2291 = vmatprep.mubr.msk.bf16.mxu1 %vm2633_vm0, %v2632_v1 }
 0x114   : > { %2292 = vmatmul.mubr.msk.bf16.gmra.mxu1 %vm515_vm12, %v583_v23  ;;  %v2909_v23 = vrot.slane %v2891_v54, %v591_v16 }
 0x115   : > { %2295 = vmatprep.mubr.msk.bf16.mxu1 %vm2633_vm0, %v2632_v1 }
 0x11c   : > { %2296 = vmatmul.mubr.msk.bf16.gmra.mxu1 %vm515_vm12, %v584_v29 }
 0x11d   : > { %2323 = vmatprep.mubr.msk.bf16.mxu1 %vm2633_vm0, %v2632_v1 }
 0x1b4   : > { %v648_v31 = vpop.f32.mrf.mxu1  ;;  %v726_v32 = vpop.f32.mrf.mxu0 }
 0x1b5   : > { %v727_v22 = vadd.f32 %v726_v32, %v679_v59  ;;  %v649_v30 = vadd.f32 %v648_v31, %v2909_v23 }
 0x1b6   : > { %v2257_v34 = vpop.f32.mrf.mxu1  ;;  %v2273_v35 = vpop.f32.mrf.mxu0 }
 0x1b7   : > { %v2918_v34 = vsel %vm831_vm7, 1.0, %v2632_v1  ;;  %v2921_v35 = vsel %vm1011_vm8, 1.0, %v2632_v1 }
 0x1b8   : > { %v651_v36 = vpop.f32.mrf.mxu1  ;;  %v729_v37 = vpop.f32.mrf.mxu0  ;;  %v835_v31 = vmul.f32 %v2918_v34, %v649_v30 }
 0x1b9   : > { %v730_v19 = vadd.f32 %v729_v37, %v679_v59  ;;  %v652_v28 = vadd.f32 %v651_v36, %v2909_v23  ;;  %v757_v37 = vrot.slane %v2891_v54, %v756_v27 }
 0x1ba   : > { %v2258_v38 = vpop.f32.mrf.mxu1  ;;  %v2274_v39 = vpop.f32.mrf.mxu0 }
 0x1bb   : > { %v827_v25 = vpack.c.bf16 %v730_v19, %v727_v22  ;;  %v836_v39 = vmul.f32 %v2918_v34, %v652_v28 }
 0x1bc   : > { %v2883_v42 = vpop.f32.mrf.mxu1  ;;  %v734_v43 = vpop.f32.mrf.mxu0 }
 0x1bd   : > { %v735_v12 = vadd.f32 %v734_v43, %v679_v59  ;;  %v863_v38 = vsel %vm515_vm12, %v827_v25, 0  ;;  %v1015_v43 = vmul.f32 %v2921_v35, %v652_v28  ;;  %v841_v53 = vpack.c.bf16 %v836_v39, %v835_v31 }
 0x1be   : > { %v2261_v45 = vpop.f32.mrf.mxu1  ;;  %v2277_v46 = vpop.f32.mrf.mxu0 }
 0x1bf   : > { %v1014_v46 = vmul.f32 %v2921_v35, %v649_v30 }
 0x1c0   : > { %v2885_v47 = vpop.f32.mrf.mxu1  ;;  %v737_v48 = vpop.f32.mrf.mxu0 }
 0x1c1   : > { %v738_v9 = vadd.f32 %v737_v48, %v679_v59 }
 0x1c2   : > { %v2262_v49 = vpop.f32.mrf.mxu1  ;;  %v2278_v52 = vpop.f32.mrf.mxu0 }
 0x1c3   : > { %v828_v14 = vpack.c.bf16 %v738_v9, %v735_v12 }
 0x1c4   : > { %v2893_v55 = vpop.f32.mrf.mxu1  ;;  %v742_v56 = vpop.f32.mrf.mxu0 }
 0x1c5   : > { %v743_v62 = vadd.f32 %v742_v56, %v679_v59  ;;  %v866_v20 = vsel %vm515_vm12, %v828_v14, 0  ;;  %v1020_v56 = vpack.c.bf16 %v1015_v43, %v1014_v46 }
 0x1c6   : > { %v2265_v57 = vpop.f32.mrf.mxu1  ;;  %v2281_v58 = vpop.f32.mrf.mxu0 }
 0x1c7   : > { %v660_v57 = vadd.f32 %v2885_v47, %v2909_v23 }
 0x1c8   : > { %v2896_v60 = vpop.f32.mrf.mxu1  ;;  %v745_v61 = vpop.f32.mrf.mxu0 }
 0x1c9   : > { %v746_v63 = vadd.f32 %v745_v61, %v679_v59  ;;  %v838_v12 = vmul.f32 %v2918_v34, %v660_v57  ;;  %v1017_v14 = vmul.f32 %v2921_v35, %v660_v57  ;;  %v668_v25 = vadd.f32 %v2896_v60, %v2909_v23 }
 0x1ca   : > { %v2266_v0 = vpop.f32.mrf.mxu1  ;;  %v2282_v4 = vpop.f32.mrf.mxu0 }
 0x1cb   : > { %v829_v7 = vpack.c.bf16 %v746_v63, %v743_v62  ;;  %v657_v4 = vadd.f32 %v2883_v42, %v2909_v23  ;;  %v840_v60 = vmul.f32 %v2918_v34, %v668_v25 }
 0x1cc   : > { %v2898_v8 = vpop.f32.mrf.mxu1 }
 0x1cd   : > { %v869_v10 = vsel %vm515_vm12, %v829_v7, 0  ;;  %v805_v42 = vadd.f32 %v2898_v8, %v757_v37  ;;  %v837_v16 = vmul.f32 %v2918_v34, %v657_v4 }
 0x1ce   : > { %v2289_v11 = vpop.f32.mrf.mxu1  ;;  %2300 = vmatpush3.bf16.xpose.msra.mxu0 %v869_v10  ;;  %2318 = vmatpush3.bf16.xpose.msra.mxu1 %v869_v10 }
 0x1cf   : > { %2301 = vmatprep.subr.bf16.mxu0 %v2632_v1  ;;  %2319 = vmatprep.subr.bf16.mxu1 %v2632_v1  ;;  %v842_v22 = vpack.c.bf16 %v838_v12, %v837_v16  ;;  %v844_v27 = vmul.f32 %v2918_v34, %v805_v42  ;;  %v1023_v28 = vmul.f32 %v2921_v35, %v805_v42 }
 0x1d0   : > { %v807_v13 = vpop.f32.mrf.mxu1 }
 0x1d1   : > { %v808_v7 = vadd.f32 %v807_v13, %v757_v37 }
 0x1d2   : > { %v2290_v15 = vpop.f32.mrf.mxu1 }
 0x1d3   : > { %v845_v19 = vmul.f32 %v2918_v34, %v808_v7 }
 0x1d4   : > { %v812_v17 = vpop.f32.mrf.mxu1 }
 0x1d5   : > { %v813_v58 = vadd.f32 %v812_v17, %v757_v37  ;;  %v1016_v17 = vmul.f32 %v2921_v35, %v657_v4  ;;  %v850_v30 = vpack.c.bf16 %v845_v19, %v844_v27 }
 0x1d6   : > { %v2293_v21 = vpop.f32.mrf.mxu1  ;;  %2302 = vmatpush3.bf16.xpose.msra.mxu0 %v866_v20  ;;  %2320 = vmatpush3.bf16.xpose.msra.mxu1 %v866_v20  ;;  %v1024_v20 = vmul.f32 %v2921_v35, %v808_v7 }
 0x1d7   : > { %2303 = vmatprep.subr.bf16.mxu0 %v2632_v1  ;;  %2321 = vmatprep.subr.bf16.mxu1 %v2632_v1  ;;  %v846_v13 = vmul.f32 %v2918_v34, %v813_v58  ;;  %v1025_v15 = vmul.f32 %v2921_v35, %v813_v58 }
 0x1d8   : > { %v815_v24 = vpop.f32.mrf.mxu1 }
 0x1d9   : > { %v816_v48 = vadd.f32 %v815_v24, %v757_v37  ;;  %v1021_v24 = vpack.c.bf16 %v1017_v14, %v1016_v17 }
 0x1da   : > { %v2294_v29 = vpop.f32.mrf.mxu1 }
 0x1db   : > { %v847_v9 = vmul.f32 %v2918_v34, %v816_v48  ;;  %v1026_v10 = vmul.f32 %v2921_v35, %v816_v48  ;;  %v665_v29 = vadd.f32 %v2893_v55, %v2909_v23 }
 0x1dc   : > { %v820_v32 = vpop.f32.mrf.mxu1 }
 0x1dd   : > { %v821_v36 = vadd.f32 %v820_v32, %v757_v37  ;;  %v851_v21 = vpack.c.bf16 %v847_v9, %v846_v13  ;;  %v1030_v8 = vpack.c.bf16 %v1026_v10, %v1025_v15  ;;  %v1029_v32 = vpack.c.bf16 %v1024_v20, %v1023_v28 }
 0x1de   : > { %v2297_v45 = vpop.f32.mrf.mxu1  ;;  %2304 = vmatpush3.bf16.xpose.msra.mxu0 %v863_v38  ;;  %2322 = vmatpush3.bf16.xpose.msra.mxu1 %v863_v38  ;;  %v839_v55 = vmul.f32 %v2918_v34, %v665_v29  ;;  %v1018_v23 = vmul.f32 %v2921_v35, %v665_v29 }
 0x1df   : > { %2335 = vmatprep.subr.bf16.mxu0 %v2632_v1  ;;  %2353 = vmatprep.subr.bf16.mxu1 %v2632_v1  ;;  %v848_v61 = vmul.f32 %v2918_v34, %v821_v36  ;;  %v1027_v62 = vmul.f32 %v2921_v35, %v821_v36 }
 0x1e0   : > { %v823_v49 = vpop.f32.mrf.mxu1  ;;  %v843_v38 = vpack.c.bf16 %v840_v60, %v839_v55 }
 0x1e1   : > { %v824_v52 = vadd.f32 %v823_v49, %v757_v37  ;;  %v1019_v37 = vmul.f32 %v2921_v35, %v668_v25 }
 0x1e2   : > { %v2298_v59 = vpop.f32.mrf.mxu1 }
 0x1e3   : > { %v849_v63 = vmul.f32 %v2918_v34, %v824_v52  ;;  %v1028_v0 = vmul.f32 %v2921_v35, %v824_v52  ;;  %v1022_v39 = vpack.c.bf16 %v1019_v37, %v1018_v23 }
 0x1e5   : > { %v852_v11 = vpack.c.bf16 %v849_v63, %v848_v61  ;;  %v1031_v47 = vpack.c.bf16 %v1028_v0, %v1027_v62  ;;  %2306 = vmatmul.mubr.msk.bf16.vlgmr.msra.gmra.mxu0 %vm515_vm12, %v841_v53  ;;  %2324 = vmatmul.mubr.msk.bf16.vlgmr.msra.gmra.mxu1 %vm515_vm12, %v1020_v56 }
 0x1e6   : > { %2309 = vmatprep.mubr.msk.bf16.mxu0 %vm2633_vm0, %v2632_v1  ;;  %2327 = vmatprep.mubr.msk.bf16.mxu1 %vm2633_vm0, %v2632_v1 }
 0x1e7   : > { %2336 = vmatpush3.bf16.msra.mxu0 %v1031_v47  ;;  %2354 = vmatpush3.bf16.msra.mxu1 %v852_v11 }
 0x1e8   : > { %2337 = vmatprep.subr.bf16.mxu0 %v2632_v1  ;;  %2355 = vmatprep.subr.bf16.mxu1 %v2632_v1 }
 0x1eb   : > { %2338 = vmatpush3.bf16.msra.mxu0 %v1030_v8  ;;  %2356 = vmatpush3.bf16.msra.mxu1 %v851_v21 }
 0x1ec   : > { %2339 = vmatprep.subr.bf16.mxu0 %v2632_v1  ;;  %2357 = vmatprep.subr.bf16.mxu1 %v2632_v1 }
 0x1ed   : > { %2310 = vmatmul.mubr.msk.bf16.gmra.mxu0 %vm515_vm12, %v842_v22  ;;  %2328 = vmatmul.mubr.msk.bf16.gmra.mxu1 %vm515_vm12, %v1021_v24 }
 0x1ee   : > { %2313 = vmatprep.mubr.msk.bf16.mxu0 %vm2633_vm0, %v2632_v1  ;;  %2331 = vmatprep.mubr.msk.bf16.mxu1 %vm2633_vm0, %v2632_v1 }
 0x1ef   : > { %2340 = vmatpush3.bf16.msra.mxu0 %v1029_v32  ;;  %2358 = vmatpush3.bf16.msra.mxu1 %v850_v30 }
 0x1f0   : > { %2371 = vmatprep.subr.bf16.mxu0 %v2632_v1 }
 0x1f5   : > { %2314 = vmatmul.mubr.msk.bf16.gmra.mxu0 %vm515_vm12, %v843_v38  ;;  %2332 = vmatmul.mubr.msk.bf16.gmra.mxu1 %vm515_vm12, %v1022_v39 }
 0x1f6   : > { %2359 = vmatprep.mubr.msk.bf16.mxu1 %vm2633_vm0, %v2632_v1  ;;  %2341 = vmatprep.mubr.msk.bf16.mxu0 %vm2633_vm0, %v2632_v1 }
 0x2a5   : > { %v905_v43 = vpop.f32.mrf.mxu0  ;;  %v1075_v45 = vpop.f32.mrf.mxu1 }
 0x2a6   : > { %v928_v34 = vmul.f32 0.25, %v905_v43  ;;  %v1098_v36 = vmul.f32 0.25, %v1075_v45 }
 0x2a7   : > { %v2307_v35 = vpop.f32.mrf.mxu0  ;;  %v2325_v31 = vpop.f32.mrf.mxu1 }
 0x2a8   : > { %v2985_v46 = vsel %vm502_vm11, %v1098_v36, -1e+30  ;;  %v2987_v48 = vsel %vm502_vm11, %v928_v34, -1e+30 }
 0x2a9   : > { %v908_v49 = vpop.f32.mrf.mxu0  ;;  %v1078_v52 = vpop.f32.mrf.mxu1  ;;  %v1110_v53 = vsel %vm940_vm9, %v2985_v46, -inf  ;;  %v941_v56 = vsel %vm940_vm9, %v2987_v48, -inf }
 0x2aa   : > { %v929_v6 = vmul.f32 0.25, %v908_v49  ;;  %v1099_v57 = vmul.f32 0.25, %v1078_v52  ;;  %1111 = vmax.xlane.f32.xlu1 %v1110_v53  ;;  %942 = vmax.xlane.f32.xlu0 %v941_v56 }
 0x2ab   : > { %v2308_v58 = vpop.f32.mrf.mxu0  ;;  %v2326_v59 = vpop.f32.mrf.mxu1 }
 0x2ac   : > { %v2995_v61 = vsel %vm503_vm10, %v1099_v57, -1e+30  ;;  %v2997_v62 = vsel %vm503_vm10, %v929_v6, -1e+30 }
 0x2ad   : > { %v913_v63 = vpop.f32.mrf.mxu0  ;;  %v1083_v0 = vpop.f32.mrf.mxu1  ;;  %v1113_v4 = vsel %vm940_vm9, %v2995_v61, -inf  ;;  %v944_v7 = vsel %vm940_vm9, %v2997_v62, -inf }
 0x2ae   : > { %v930_v18 = vmul.f32 0.25, %v913_v63  ;;  %v1100_v9 = vmul.f32 0.25, %v1083_v0  ;;  %1114 = vmax.xlane.f32.xlu1 %v1113_v4  ;;  %945 = vmax.xlane.f32.xlu0 %v944_v7 }
 0x2af   : > { %v2311_v10 = vpop.f32.mrf.mxu0  ;;  %v2329_v11 = vpop.f32.mrf.mxu1 }
 0x2b0   : > { %v936_v47 = vsel %vm504_vm13, %v930_v18, -1e+30  ;;  %v1106_v16 = vsel %vm504_vm13, %v1100_v9, -1e+30 }
 0x2b1   : > { %v916_v12 = vpop.f32.mrf.mxu0  ;;  %v1086_v14 = vpop.f32.mrf.mxu1  ;;  %v947_v42 = vsel %vm940_vm9, %v936_v47, -inf  ;;  %v1116_v8 = vsel %vm940_vm9, %v1106_v16, -inf }
 0x2b2   : > { %v931_v13 = vmul.f32 0.25, %v916_v12  ;;  %v1101_v15 = vmul.f32 0.25, %v1086_v14  ;;  %948 = vmax.xlane.f32.xlu0 %v947_v42 }
 0x2b3   : > { %v2312_v17 = vpop.f32.mrf.mxu0  ;;  %v2330_v40 = vpop.f32.mrf.mxu1 }
 0x2b4   : > { %v937_v19 = vsel %vm505_vm14, %v931_v13, -1e+30  ;;  %v1107_v27 = vsel %vm505_vm14, %v1101_v15, -1e+30 }
 0x2b5   : > { %v921_v20 = vpop.f32.mrf.mxu0  ;;  %v1091_v21 = vpop.f32.mrf.mxu1  ;;  %v950_v22 = vsel %vm940_vm9, %v937_v19, -inf  ;;  %v1119_v37 = vsel %vm940_vm9, %v1107_v27, -inf }
 0x2b6   : > { %v932_v24 = vmul.f32 0.25, %v921_v20  ;;  %v1102_v25 = vmul.f32 0.25, %v1091_v21  ;;  %1117 = vmax.xlane.f32.xlu0 %v1116_v8  ;;  %951 = vmax.xlane.f32.xlu1 %v950_v22 }
 0x2b7   : > { %v2315_v28 = vpop.f32.mrf.mxu0  ;;  %v2333_v29 = vpop.f32.mrf.mxu1 }
 0x2b8   : > { %v938_v30 = vsel %vm506_vm15, %v932_v24, -1e+30  ;;  %v1108_v44 = vsel %vm506_vm15, %v1102_v25, -1e+30 }
 0x2b9   : > { %v924_v32 = vpop.f32.mrf.mxu0  ;;  %v1094_v60 = vpop.f32.mrf.mxu1  ;;  %v953_v55 = vsel %vm940_vm9, %v938_v30, -inf  ;;  %v1122_v34 = vsel %vm940_vm9, %v1108_v44, -inf }
 0x2ba   : > { %v933_v23 = vmul.f32 0.25, %v924_v32  ;;  %v1103_v38 = vmul.f32 0.25, %v1094_v60  ;;  %1120 = vmax.xlane.f32.xlu1 %v1119_v37  ;;  %954 = vmax.xlane.f32.xlu0 %v953_v55 }
 0x2bb   : > { %v2316_v39 = vpop.f32.mrf.mxu0  ;;  %v2334_v43 = vpop.f32.mrf.mxu1 }
 0x2bc   : > { %v939_v45 = vsel %vm507_vm1, %v933_v23, -1e+30  ;;  %v1109_v35 = vsel %vm507_vm1, %v1103_v38, -1e+30 }
 0x2bd   : > { %v956_v36 = vsel %vm940_vm9, %v939_v45, -inf  ;;  %v1125_v51 = vsel %vm940_vm9, %v1109_v35, -inf }
 0x2be   : > { %1123 = vmax.xlane.f32.xlu0 %v1122_v34  ;;  %957 = vmax.xlane.f32.xlu1 %v956_v36 }
 0x2c2   : > { %1126 = vmax.xlane.f32.xlu1 %v1125_v51 }
 0x333   : > { %v1112_v31 = vpop.xlane.xlu1 %1111  ;;  %v943_v49 = vpop.xlane.xlu0 %942 }
 0x334   : > { %v1128_v52 = vsub.f32 %v2985_v46, %v1112_v31  ;;  %v959_v50 = vsub.f32 %v2987_v48, %v943_v49 }
 0x336   : > { %v965_v53 = vmul.f32 1.442695, %v959_v50  ;;  %v1134_v56 = vmul.f32 1.442695, %v1128_v52 }
 0x337   : > { %v1115_v6 = vpop.xlane.xlu1 %1114  ;;  %v946_v57 = vpop.xlane.xlu0 %945 }
 0x338   : > { %v1129_v58 = vsub.f32 %v2995_v61, %v1115_v6  ;;  %v960_v59 = vsub.f32 %v2997_v62, %v946_v57  ;;  %2501 = vpow2.f32 %v965_v53 }
 0x339   : > { %2503 = vpow2.f32 %v1134_v56 }
 0x33a   : > { %v967_v63 = vmul.f32 1.442695, %v960_v59  ;;  %v1136_v0 = vmul.f32 1.442695, %v1129_v58 }
 0x33b   : > { %v949_v4 = vpop.xlane.xlu0 %948 }
 0x33c   : > { %v961_v7 = vsub.f32 %v936_v47, %v949_v4  ;;  %2505 = vpow2.f32 %v967_v63 }
 0x33d   : > { %2507 = vpow2.f32 %v1136_v0 }
 0x33e   : > { %v969_v18 = vmul.f32 1.442695, %v961_v7 }
 0x33f   : > { %v1118_v46 = vpop.xlane.xlu0 %1117  ;;  %v952_v9 = vpop.xlane.xlu1 %951 }
 0x340   : > { %2509 = vpow2.f32 %v969_v18  ;;  %v1130_v48 = vsub.f32 %v1106_v16, %v1118_v46  ;;  %v962_v10 = vsub.f32 %v937_v19, %v952_v9 }
 0x342   : > { %v1138_v11 = vmul.f32 1.442695, %v1130_v48  ;;  %v971_v12 = vmul.f32 1.442695, %v962_v10 }
 0x343   : > { %v1121_v14 = vpop.xlane.xlu1 %1120  ;;  %v955_v61 = vpop.xlane.xlu0 %954 }
 0x344   : > { %2511 = vpow2.f32 %v1138_v11  ;;  %v1131_v62 = vsub.f32 %v1107_v27, %v1121_v14  ;;  %v963_v42 = vsub.f32 %v938_v30, %v955_v61 }
 0x345   : > { %2513 = vpow2.f32 %v971_v12  ;;  %v3035_v13 = vpop.eup %2501 }
 0x346   : > { %v1140_v15 = vmul.f32 1.442695, %v1131_v62  ;;  %v973_v47 = vmul.f32 1.442695, %v963_v42  ;;  %v977_v17 = vsel %vm940_vm9, %v3035_v13, 0.0  ;;  %v3039_v21 = vpop.eup %2503 }
 0x347   : > { %v1124_v40 = vpop.xlane.xlu0 %1123  ;;  %v958_v20 = vpop.xlane.xlu1 %957  ;;  %978 = vadd.xlane.f32.xlu0 %v977_v17  ;;  %v1146_v25 = vsel %vm940_vm9, %v3039_v21, 0.0 }
 0x348   : > { %2515 = vpow2.f32 %v1140_v15  ;;  %v1132_v16 = vsub.f32 %v1108_v44, %v1124_v40  ;;  %v964_v19 = vsub.f32 %v939_v45, %v958_v20 }
 0x349   : > { %2517 = vpow2.f32 %v973_v47  ;;  %v2506_v8 = vpop.eup %2505 }
 0x34a   : > { %v1142_v22 = vmul.f32 1.442695, %v1132_v16  ;;  %v975_v24 = vmul.f32 1.442695, %v964_v19  ;;  %v980_v27 = vsel %vm940_vm9, %v2506_v8, 0.0  ;;  %v3044_v29 = vpop.eup %2507 }
 0x34b   : > { %v1127_v28 = vpop.xlane.xlu1 %1126  ;;  %1147 = vadd.xlane.f32.xlu0 %v1146_v25  ;;  %981 = vadd.xlane.f32.xlu1 %v980_v27  ;;  %v1149_v55 = vsel %vm940_vm9, %v3044_v29, 0.0 }
 0x34c   : > { %2519 = vpow2.f32 %v1142_v22  ;;  %v1133_v30 = vsub.f32 %v1109_v35, %v1127_v28 }
 0x34d   : > { %v3046_v32 = vpop.eup %2509  ;;  %2521 = vpow2.f32 %v975_v24 }
 0x34e   : > { %v1144_v60 = vmul.f32 1.442695, %v1133_v30  ;;  %v983_v37 = vsel %vm940_vm9, %v3046_v32, 0.0 }
 0x34f   : > { %984 = vadd.xlane.f32.xlu0 %v983_v37  ;;  %1150 = vadd.xlane.f32.xlu1 %v1149_v55 }
 0x350   : > { %2523 = vpow2.f32 %v1144_v60 }
 0x351   : > { %v3052_v23 = vpop.eup %2511 }
 0x352   : > { %v2514_v38 = vpop.eup %2513  ;;  %v1152_v44 = vsel %vm940_vm9, %v3052_v23, 0.0 }
 0x353   : > { %v986_v39 = vsel %vm940_vm9, %v2514_v38, 0.0  ;;  %1153 = vadd.xlane.f32.xlu0 %v1152_v44 }
 0x354   : > { %987 = vadd.xlane.f32.xlu1 %v986_v39 }
 0x355   : > { %v2516_v43 = vpop.eup %2515 }
 0x356   : > { %v3057_v45 = vpop.eup %2517  ;;  %v1155_v34 = vsel %vm940_vm9, %v2516_v43, 0.0 }
 0x357   : > { %v989_v36 = vsel %vm940_vm9, %v3057_v45, 0.0 }
 0x358   : > { %990 = vadd.xlane.f32.xlu0 %v989_v36  ;;  %1156 = vadd.xlane.f32.xlu1 %v1155_v34 }
 0x359   : > { %v3062_v35 = vpop.eup %2519 }
 0x35a   : > { %v3064_v51 = vpop.eup %2521  ;;  %v1158_v31 = vsel %vm940_vm9, %v3062_v35, 0.0 }
 0x35b   : > { %v992_v49 = vsel %vm940_vm9, %v3064_v51, 0.0 }
 0x35c   : > { %1159 = vadd.xlane.f32.xlu0 %v1158_v31  ;;  %993 = vadd.xlane.f32.xlu1 %v992_v49 }
 0x35d   : > { %v3070_v52 = vpop.eup %2523 }
 0x35e   : > { %v1161_v50 = vsel %vm940_vm9, %v3070_v52, 0.0 }
 0x360   : > { %1162 = vadd.xlane.f32.xlu1 %v1161_v50 }
 0x3d0   : > { %v979_v53 = vpop.xlane.xlu0 %978 }
 0x3d1   : > { %2525 = vrcp.f32 %v979_v53 }
 0x3d4   : > { %v1148_v56 = vpop.xlane.xlu0 %1147  ;;  %v982_v6 = vpop.xlane.xlu1 %981 }
 0x3d5   : > { %2527 = vrcp.f32 %v982_v6 }
 0x3d6   : > { %2529 = vrcp.f32 %v1148_v56 }
 0x3d8   : > { %v985_v57 = vpop.xlane.xlu0 %984  ;;  %v1151_v58 = vpop.xlane.xlu1 %1150 }
 0x3d9   : > { %2531 = vrcp.f32 %v1151_v58 }
 0x3da   : > { %2533 = vrcp.f32 %v985_v57 }
 0x3dc   : > { %v1154_v59 = vpop.xlane.xlu0 %1153 }
 0x3dd   : > { %v988_v63 = vpop.xlane.xlu1 %987 }
 0x3de   : > { %2535 = vrcp.f32 %v988_v63  ;;  %v2526_v7 = vpop.eup %2525 }
 0x3df   : > { %2537 = vrcp.f32 %v1154_v59  ;;  %v996_v46 = vmul.f32 %v2526_v7, %v3035_v13 }
 0x3e1   : > { %v991_v0 = vpop.xlane.xlu0 %990  ;;  %v1157_v4 = vpop.xlane.xlu1 %1156 }
 0x3e2   : > { %2539 = vrcp.f32 %v1157_v4  ;;  %v2528_v18 = vpop.eup %2527 }
 0x3e3   : > { %v998_v9 = vmul.f32 %v2528_v18, %v2506_v8  ;;  %2541 = vrcp.f32 %v991_v0  ;;  %v2530_v11 = vpop.eup %2529 }
 0x3e4   : > { %v1165_v61 = vmul.f32 %v2530_v11, %v3039_v21 }
 0x3e5   : > { %v1160_v48 = vpop.xlane.xlu0 %1159  ;;  %v994_v10 = vpop.xlane.xlu1 %993  ;;  %v1007_v12 = vpack.c.bf16 %v998_v9, %v996_v46 }
 0x3e6   : > { %2543 = vrcp.f32 %v994_v10  ;;  %v2532_v14 = vpop.eup %2531 }
 0x3e7   : > { %2545 = vrcp.f32 %v1160_v48  ;;  %v1167_v62 = vmul.f32 %v2532_v14, %v3044_v29  ;;  %2360 = vmatmul.mubr.msk.bf16.vlgmr.msra.gmra.mxu1 %vm940_vm9, %v1007_v12  ;;  %v2534_v15 = vpop.eup %2533 }
 0x3e8   : > { %2363 = vmatprep.mubr.msk.bf16.mxu1 %vm2633_vm0, %v2632_v1  ;;  %v1000_v17 = vmul.f32 %v2534_v15, %v3046_v32  ;;  %v415_v15 = vmul.u32 6, %v2793_v41 }
 0x3e9   : > { %v1163_v42 = vpop.xlane.xlu1 %1162  ;;  %v1176_v13 = vpack.c.bf16 %v1167_v62, %v1165_v61 }
 0x3ea   : > { %2547 = vrcp.f32 %v1163_v42 }
 0x3eb   : > { %v2536_v47 = vpop.eup %2535  ;;  %2342 = vmatmul.mubr.msk.bf16.vlgmr.msra.gmra.mxu0 %vm940_vm9, %v1176_v13  ;;  %v2080_v13 = vadd.s32 4294967280, %v2773_v26 }
 0x3ec   : > { %v1002_v40 = vmul.f32 %v2536_v47, %v2514_v38  ;;  %v2538_v20 = vpop.eup %2537  ;;  %2345 = vmatprep.mubr.msk.bf16.mxu0 %vm2633_vm0, %v2632_v1  ;;  %v2490_v38 = vld [vmem:[%s3361_s1 + $0x30] sm:$0xff]   ;;  %v2081_v47 = vadd.s32 4294967272, %v2782_v33 }
 0x3ed   : > { %v1169_v19 = vmul.f32 %v2538_v20, %v3052_v23  ;;  %v2489_v23 = vld [vmem:[%s3361_s1 + $0x38] sm:$0xff]   ;;  %vm486_vm6 = vcmp.eq.s32.totalorder %v2080_v13, %v2793_v41 }
 0x3ee   : > { %v1008_v21 = vpack.c.bf16 %v1002_v40, %v1000_v17  ;;  %2372 = vmatpush3.bf16.msra.mxu0 %v2489_v23  ;;  %v416_v17 = vsub.s32 %v2727_v3, %v415_v15  ;;  %v2079_v40 = vadd.s32 4294967288, %v2735_v5  ;;  %vm487_vm7 = vcmp.eq.s32.totalorder %v2081_v47, %v2793_v41 }
 0x3ef   : > { %v2540_v16 = vpop.eup %2539  ;;  %2373 = vmatprep.subr.bf16.mxu0 %v2632_v1 }
 0x3f0   : > { %2364 = vmatmul.mubr.msk.bf16.gmra.mxu1 %vm940_vm9, %v1008_v21  ;;  %v1171_v8 = vmul.f32 %v2540_v16, %v2516_v43  ;;  %v2542_v22 = vpop.eup %2541  ;;  %vm485_vm2 = vcmp.eq.s32.totalorder %v2079_v40, %v2793_v41  ;;  %vm2082_vm3 = vcmp.eq.s32.totalorder %v416_v17, 0  ;;  %vm2083_vm4 = vcmp.eq.s32.totalorder %v416_v17, 1 }
 0x3f1   : > { %2367 = vmatprep.mubr.msk.bf16.mxu1 %vm2633_vm0, %v2632_v1  ;;  %v1004_v28 = vmul.f32 %v2542_v22, %v3057_v45  ;;  %vm2084_vm8 = vcmp.eq.s32.totalorder %v416_v17, 2  ;;  %vm2085_vm11 = vcmp.eq.s32.totalorder %v416_v17, 3  ;;  %vm493_vm10 = vmand %vm485_vm2, %vm2083_vm4 }
 0x3f2   : > { %v1177_v24 = vpack.c.bf16 %v1171_v8, %v1169_v19  ;;  %2374 = vmatpush3.bf16.msra.mxu0 %v2490_v38  ;;  %v497_v3 = vsel %vm493_vm10, 1.0, %v2632_v1  ;;  %vm494_vm13 = vmand %vm486_vm6, %vm2084_vm8 }
 0x3f3   : > { %v2544_v25 = vpop.eup %2543  ;;  %vm495_vm14 = vmand %vm487_vm7, %vm2085_vm11  ;;  %v498_v33 = vsel %vm494_vm13, 1.0, %v2632_v1 }
 0x3f4   : > { %v2546_v27 = vpop.eup %2545  ;;  %2346 = vmatmul.mubr.msk.bf16.gmra.mxu0 %vm940_vm9, %v1177_v24  ;;  %v1006_v29 = vmul.f32 %v2544_v25, %v3064_v51  ;;  %v499_v20 = vsel %vm495_vm14, 1.0, %v2632_v1 }
 0x3f5   : > { %2349 = vmatprep.mubr.msk.bf16.mxu0 %vm2633_vm0, %v2632_v1  ;;  %v1173_v60 = vmul.f32 %v2546_v27, %v3062_v35  ;;  %v501_v21 = vpack.c.bf16 %v499_v20, %v498_v33  ;;  %v1547_v33 = vld [vmem:[%s3365_s5 + $0x78] sm:$0xff]  ;;  %v1544_v20 = vld [vmem:[%s3365_s5 + $0x60] sm:$0xff] }
 0x3f6   : > { %v1009_v32 = vpack.c.bf16 %v1006_v29, %v1004_v28  ;;  %v1321_v28 = vsub.s32 3, %v2725_v2 }
 0x3f7   : > { %v2548_v30 = vpop.eup %2547 }
 0x3f8   : > { %v1175_v37 = vmul.f32 %v2548_v30, %v3070_v52  ;;  %2368 = vmatmul.mubr.msk.bf16.gmra.mxu1 %vm940_vm9, %v1009_v32  ;;  %v1322_v32 = vrot.slane %v2891_v54, %v1321_v28  ;;  %v1549_v28 = vld [vmem:[%s3365_s5 + $0x88] sm:$0xff] }
 0x3fa   : > { %v1178_v55 = vpack.c.bf16 %v1175_v37, %v1173_v60 }
 0x3fc   : > { %2350 = vmatmul.mubr.msk.bf16.gmra.mxu0 %vm940_vm9, %v1178_v55 }
 0x3fd   : > { %2375 = vmatprep.mubr.msk.bf16.mxu0 %vm2633_vm0, %v2632_v1 }
 0x4a7   : > { %v1288_v44 = vpop.f32.mrf.mxu1 }
 0x4a9   : > { %v2361_v39 = vpop.f32.mrf.mxu1 }
 0x4ab   : > { %v1222_v43 = vpop.f32.mrf.mxu0  ;;  %v1291_v45 = vpop.f32.mrf.mxu1 }
 0x4ac   : > { %v1289_v31 = vadd.f32 %v1288_v44, %v1222_v43 }
 0x4ad   : > { %v2343_v34 = vpop.f32.mrf.mxu0  ;;  %v2362_v36 = vpop.f32.mrf.mxu1 }
 0x4ae   : > { %v2565_v36 = vld [vmem:[%s2749_s13 + $0x10] sm:$0xff] }
 0x4af   : > { %v1225_v35 = vpop.f32.mrf.mxu0 }
 0x4b0   : > { %v1296_v51 = vpop.f32.mrf.mxu1  ;;  %v1292_v49 = vadd.f32 %v1291_v45, %v1225_v35 }
 0x4b1   : > { %v2344_v52 = vpop.f32.mrf.mxu0 }
 0x4b2   : > { %v2365_v50 = vpop.f32.mrf.mxu1  ;;  %v1311_v53 = vpack.c.bf16 %v1292_v49, %v1289_v31  ;;  %v2566_v31 = vld [vmem:[%s2749_s13] sm:$0xff] }
 0x4b4   : > { %v1230_v56 = vpop.f32.mrf.mxu0  ;;  %v1299_v6 = vpop.f32.mrf.mxu1  ;;  %2376 = vmatmul.mubr.msk.bf16.vlgmr.msra.gmra.mxu0 %vm515_vm12, %v1311_v53  ;;  %v2567_v53 = vld [vmem:[%s2749_s13 + $0x18] sm:$0xff] }
 0x4b5   : > { %2379 = vmatprep.mubr.msk.bf16.mxu0 %vm2633_vm0, %v2632_v1  ;;  %v1297_v0 = vadd.f32 %v1296_v51, %v1230_v56 }
 0x4b6   : > { %v2347_v57 = vpop.f32.mrf.mxu0  ;;  %v2366_v58 = vpop.f32.mrf.mxu1 }
 0x4b8   : > { %v1233_v59 = vpop.f32.mrf.mxu0  ;;  %v1304_v63 = vpop.f32.mrf.mxu1 }
 0x4b9   : > { %v1300_v4 = vadd.f32 %v1299_v6, %v1233_v59  ;;  %v2568_v59 = vld [vmem:[%s2749_s13 + $0x8] sm:$0xff] }
 0x4ba   : > { %v2348_v7 = vpop.f32.mrf.mxu0  ;;  %v2369_v18 = vpop.f32.mrf.mxu1 }
 0x4bb   : > { %v1312_v46 = vpack.c.bf16 %v1300_v4, %v1297_v0 }
 0x4bc   : > { %v1238_v9 = vpop.f32.mrf.mxu0  ;;  %v1307_v48 = vpop.f32.mrf.mxu1 }
 0x4bd   : > { %2380 = vmatmul.mubr.msk.bf16.gmra.mxu0 %vm515_vm12, %v1312_v46  ;;  %v1305_v14 = vadd.f32 %v1304_v63, %v1238_v9 }
 0x4be   : > { %v2351_v10 = vpop.f32.mrf.mxu0  ;;  %v2370_v11 = vpop.f32.mrf.mxu1  ;;  %2383 = vmatprep.mubr.msk.bf16.mxu0 %vm2633_vm0, %v2632_v1  ;;  %vm484_vm0 = vcmp.eq.s32.totalorder %v2725_v2, %v2793_v41 }
 0x4bf   : > { %vm492_vm5 = vmand %vm484_vm0, %vm2082_vm3 }
 0x4c0   : > { %v1241_v12 = vpop.f32.mrf.mxu0  ;;  %v496_v26 = vsel %vm492_vm5, 1.0, %v2632_v1 }
 0x4c1   : > { %v1308_v61 = vadd.f32 %v1307_v48, %v1241_v12  ;;  %v500_v5 = vpack.c.bf16 %v497_v3, %v496_v26 }
 0x4c2   : > { %v2352_v62 = vpop.f32.mrf.mxu0 }
 0x4c3   : > { %v1313_v42 = vpack.c.bf16 %v1308_v61, %v1305_v14  ;;  %2393 = vmatprep.mubr.msk.bf16.mxu1 %vm940_vm9, %v500_v5  ;;  %v2491_v5 = vld [vmem:[%s3363_s3] sm:$0xff]  }
 0x4c5   : > { %2384 = vmatmul.mubr.msk.bf16.gmra.mxu0 %vm515_vm12, %v1313_v42 }
 0x574   : > { %v1378_v16 = vpop.f32.mrf.mxu0 }
 0x575   : > { %v1379_v45 = vadd.f32 %v1378_v16, %v1322_v32  ;;  %v1539_v16 = vld [vmem:[%s3365_s5 + $0x38] sm:$0xff] }
 0x576   : > { %v2377_v19 = vpop.f32.mrf.mxu0 }
 0x577   : > { %v1545_v19 = vld [vmem:[%s3365_s5 + $0x68] sm:$0xff] }
 0x578   : > { %v1381_v41 = vpop.f32.mrf.mxu0 }
 0x579   : > { %v1382_v39 = vadd.f32 %v1381_v41, %v1322_v32  ;;  %v1537_v41 = vld [vmem:[%s3365_s5 + $0x28] sm:$0xff] }
 0x57a   : > { %v2378_v8 = vpop.f32.mrf.mxu0 }
 0x57b   : > { %v1401_v34 = vpack.c.bf16 %v1382_v39, %v1379_v45  ;;  %v1542_v8 = vld [vmem:[%s3365_s5 + $0x50] sm:$0xff] }
 0x57d   : > { %v1386_v22 = vpop.f32.mrf.mxu0 }
 0x57e   : > { %v1387_v38 = vadd.f32 %v1386_v22, %v1322_v32  ;;  %v1535_v22 = vld [vmem:[%s3365_s5 + $0x18] sm:$0xff] }
 0x57f   : > { %v2381_v24 = vpop.f32.mrf.mxu0 }
 0x580   : > { %v1543_v24 = vld [vmem:[%s3365_s5 + $0x58] sm:$0xff] }
 0x581   : > { %v1389_v25 = vpop.f32.mrf.mxu0 }
 0x582   : > { %v1390_v37 = vadd.f32 %v1389_v25, %v1322_v32  ;;  %v1533_v25 = vld [vmem:[%s3365_s5 + $0x8] sm:$0xff] }
 0x583   : > { %v2382_v27 = vpop.f32.mrf.mxu0 }
 0x584   : > { %v1402_v43 = vpack.c.bf16 %v1390_v37, %v1387_v38  ;;  %v1540_v27 = vld [vmem:[%s3365_s5 + $0x40] sm:$0xff]  ;;  %v1534_v37 = vld [vmem:[%s3365_s5 + $0x10] sm:$0xff] }
 0x585   : > { %v1394_v29 = vpop.f32.mrf.mxu0 }
 0x586   : > { %v1395_v1 = vadd.f32 %v1394_v29, %v1322_v32  ;;  %v1541_v29 = vld [vmem:[%s3365_s5 + $0x48] sm:$0xff] }
 0x587   : > { %v2385_v30 = vpop.f32.mrf.mxu0 }
 0x588   : > { %v1551_v30 = vld [vmem:[%s3365_s5 + $0x98] sm:$0xff] }
 0x589   : > { %v1397_v60 = vpop.f32.mrf.mxu0 }
 0x58a   : > { %v1398_v55 = vadd.f32 %v1397_v60, %v1322_v32  ;;  %v1538_v32 = vld [vmem:[%s3365_s5 + $0x30] sm:$0xff]  ;;  %v1536_v60 = vld [vmem:[%s3365_s5 + $0x20] sm:$0xff] }
 0x58b   : > { %v2386_v23 = vpop.f32.mrf.mxu0 }
 0x58c   : > { %v1403_v44 = vpack.c.bf16 %v1398_v55, %v1395_v1  ;;  %v1532_v1 = vld [vmem:[%s3365_s5] sm:$0xff]  ;;  %v1550_v23 = vld [vmem:[%s3365_s5 + $0x90] sm:$0xff] }
 0x58d   : > { %v1548_v55 = vld [vmem:[%s3365_s5 + $0x80] sm:$0xff] }
 0x58e   : > { %2387 = vmatprep.subr.bf16.mxu1 %v1403_v44 }
 0x58f   : > { %2388 = vmatpush3.bf16.msra.mxu1 %v1403_v44 }
 0x590   : > { %2389 = vmatprep.subr.bf16.mxu1 %v1402_v43 }
 0x593   : > { %2390 = vmatpush3.bf16.msra.mxu1 %v1402_v43 }
 0x594   : > { %2391 = vmatprep.subr.bf16.mxu1 %v1401_v34 }
 0x597   : > { %2392 = vmatpush3.bf16.msra.mxu1 %v1401_v34 }
 0x59a   : > { %2394 = vmatmul.mubr.msk.bf16.vlgmr.msra.gmra.mxu1 %vm940_vm9, %v501_v21  ;;  %v1546_v21 = vld [vmem:[%s3365_s5 + $0x70] sm:$0xff] }
 0x59b   : > { %2401 = vmatprep.mubr.msk.bf16.mxu1 %vm515_vm12, %v2491_v5  ;;  %v2499_v5 = vld [vmem:[%s3364_s4] sm:$0xff]  }
 0x59c   : > { %2433 = vmatprep.mubr.bf16.mxu0 %v2499_v5 }
 0x65a   : > { %v2395_v54 = vpop.f32.mrf.mxu1 }
 0x65b   : > { %v1461_v35 = vadd.f32 %v2565_v36, %v2395_v54 }
 0x65c   : > { %v1444_v51 = vpop.f32.mrf.mxu1 }
 0x65d   : > { %v1459_v49 = vadd.f32 %v2566_v31, %v1444_v51  ;;  %v1469_v52 = vsel %vm515_vm12, %v1461_v35, 0.0 }
 0x65e   : > { %1470 = vadd.xlane.f32.xlu0 %v1469_v52  ;;  %v2396_v50 = vpop.f32.mrf.mxu1  ;;  %v1518_v52 = vsub.s32 4, %v2725_v2 }
 0x65f   : > { %v1462_v56 = vadd.f32 %v2567_v53, %v2396_v50  ;;  %v1463_v57 = vsel %vm515_vm12, %v1459_v49, 0.0 }
 0x660   : > { %v1447_v6 = vpop.f32.mrf.mxu1 }
 0x661   : > { %v1472_v58 = vsel %vm515_vm12, %v1462_v56, 0.0  ;;  %v1460_v63 = vadd.f32 %v2568_v59, %v1447_v6 }
 0x662   : > { %1464 = vadd.xlane.f32.xlu0 %v1463_v57  ;;  %1473 = vadd.xlane.f32.xlu1 %v1472_v58  ;;  %v1526_v57 = vsub.s32 5, %v2725_v2 }
 0x663   : > { %v1466_v0 = vsel %vm515_vm12, %v1460_v63, 0.0 }
 0x666   : > { %1467 = vadd.xlane.f32.xlu1 %v1466_v0 }
 0x6e7   : > { %v1471_v4 = vpop.xlane.xlu0 %1470 }
 0x6e8   : > { %v1478_v7 = vmul.f32 0.03125, %v1471_v4 }
 0x6ea   : > { %v3139_v18 = vsub.f32 %v1461_v35, %v1478_v7 }
 0x6eb   : > { %v1465_v46 = vpop.xlane.xlu0 %1464  ;;  %v1474_v9 = vpop.xlane.xlu1 %1473 }
 0x6ec   : > { %v1476_v48 = vmul.f32 0.03125, %v1465_v46  ;;  %v1479_v10 = vmul.f32 0.03125, %v1474_v9  ;;  %v1486_v11 = vmul.f32 %v3139_v18, %v3139_v18 }
 0x6ee   : > { %v3143_v12 = vsub.f32 %v1459_v49, %v1476_v48  ;;  %v3145_v14 = vsub.f32 %v1462_v56, %v1479_v10  ;;  %v1494_v61 = vsel %vm515_vm12, %v1486_v11, 0.0  ;;  %v3228_v56 = vld [vmem:[%s3362_s2] sm:$0xff] }
 0x6ef   : > { %1495 = vadd.xlane.f32.xlu0 %v1494_v61  ;;  %v1468_v62 = vpop.xlane.xlu1 %1467  ;;  %v1519_v6 = vrot.slane %v3228_v56, %v1518_v52  ;;  %v1527_v7 = vrot.slane %v3228_v56, %v1526_v57 }
 0x6f0   : > { %v1477_v42 = vmul.f32 0.03125, %v1468_v62  ;;  %v1484_v15 = vmul.f32 %v3143_v12, %v3143_v12  ;;  %v1487_v13 = vmul.f32 %v3145_v14, %v3145_v14 }
 0x6f2   : > { %v3152_v47 = vsub.f32 %v1460_v63, %v1477_v42  ;;  %v1488_v17 = vsel %vm515_vm12, %v1484_v15, 0.0  ;;  %v1497_v40 = vsel %vm515_vm12, %v1487_v13, 0.0  ;;  %v2492_v15 = vld [vmem:[%s3363_s3 + $0x8] sm:$0xff]   ;;  %v2493_v13 = vld [vmem:[%s3363_s3 + $0x10] sm:$0xff]  }
 0x6f3   : > { %1489 = vadd.xlane.f32.xlu0 %v1488_v17  ;;  %1498 = vadd.xlane.f32.xlu1 %v1497_v40  ;;  %v2495_v17 = vld [vmem:[%s3363_s3 + $0x20] sm:$0xff]   ;;  %v2496_v40 = vld [vmem:[%s3363_s3 + $0x28] sm:$0xff]  }
 0x6f4   : > { %v1485_v26 = vmul.f32 %v3152_v47, %v3152_v47 }
 0x6f6   : > { %v1491_v3 = vsel %vm515_vm12, %v1485_v26, 0.0  ;;  %v2497_v26 = vld [vmem:[%s3363_s3 + $0x30] sm:$0xff]  }
 0x6f7   : > { %1492 = vadd.xlane.f32.xlu1 %v1491_v3  ;;  %v2498_v3 = vld [vmem:[%s3363_s3 + $0x38] sm:$0xff]  }
 0x708   : > { %1647 = vperm.xlu1 %2482, %v1547_v33  }
 0x709   : > { %1642 = vperm.xlu0 %2481, %v1546_v21  }
 0x70c   : > { %1632 = vperm.xlu1 %2482, %v1544_v20  }
 0x70d   : > { %1607 = vperm.xlu0 %2481, %v1539_v16  }
 0x710   : > { %1637 = vperm.xlu1 %2482, %v1545_v19  }
 0x711   : > { %1597 = vperm.xlu0 %2481, %v1537_v41  }
 0x714   : > { %1622 = vperm.xlu1 %2482, %v1542_v8  }
 0x715   : > { %1587 = vperm.xlu0 %2481, %v1535_v22  }
 0x718   : > { %1627 = vperm.xlu1 %2482, %v1543_v24  }
 0x719   : > { %1577 = vperm.xlu0 %2481, %v1533_v25  }
 0x71c   : > { %1612 = vperm.xlu1 %2482, %v1540_v27  }
 0x71d   : > { %1846 = vperm.xlu0 %2481, %v1549_v28  }
 0x720   : > { %1617 = vperm.xlu1 %2482, %v1541_v29  }
 0x721   : > { %1856 = vperm.xlu0 %2481, %v1551_v30  }
 0x724   : > { %1602 = vperm.xlu1 %2482, %v1538_v32  }
 0x728   : > { %1592 = vperm.xlu1 %2482, %v1536_v60  }
 0x72c   : > { %1582 = vperm.xlu1 %2482, %v1534_v37  }
 0x730   : > { %1572 = vperm.xlu1 %2482, %v1532_v1  }
 0x734   : > { %1841 = vperm.xlu1 %2482, %v1548_v55  }
 0x738   : > { %1851 = vperm.xlu1 %2482, %v1550_v23  }
 0x778   : > { %v1496_v38 = vpop.xlane.xlu0 %1495 }
 0x779   : > { %v1502_v44 = vmul.f32 0.03125, %v1496_v38 }
 0x77b   : > { %v1506_v39 = vadd.f32 1e-05, %v1502_v44 }
 0x77c   : > { %v1490_v43 = vpop.xlane.xlu0 %1489  ;;  %v1499_v45 = vpop.xlane.xlu1 %1498 }
 0x77d   : > { %2549 = vrsqrt.f32 %v1506_v39  ;;  %v1500_v34 = vmul.f32 0.03125, %v1490_v43  ;;  %v1503_v54 = vmul.f32 0.03125, %v1499_v45 }
 0x77f   : > { %v1504_v36 = vadd.f32 1e-05, %v1500_v34  ;;  %v1507_v35 = vadd.f32 1e-05, %v1503_v54 }
 0x780   : > { %v1493_v51 = vpop.xlane.xlu1 %1492 }
 0x781   : > { %2551 = vrsqrt.f32 %v1504_v36  ;;  %v1501_v31 = vmul.f32 0.03125, %v1493_v51 }
 0x782   : > { %2553 = vrsqrt.f32 %v1507_v35 }
 0x783   : > { %v1505_v49 = vadd.f32 1e-05, %v1501_v31 }
 0x784   : > { %v1648_v33 = vpop.permute.xlu1 %1647  ;;  %v1643_v55 = vpop.permute.xlu0 %1642 }
 0x785   : > { %2555 = vrsqrt.f32 %v1505_v49 }
 0x788   : > { %v1633_v20 = vpop.permute.xlu1 %1632  ;;  %v1608_v54 = vpop.permute.xlu0 %1607 }
 0x78a   : > { %v2550_v50 = vpop.eup %2549 }
 0x78b   : > { %v1514_v53 = vmul.f32 %v2550_v50, %v3139_v18 }
 0x78c   : > { %v1638_v16 = vpop.permute.xlu1 %1637 }
 0x78d   : > { %v1522_v4 = vmul.f32 %v1519_v6, %v1514_v53 }
 0x78e   : > { %v2552_v58 = vpop.eup %2551 }
 0x78f   : > { %v2554_v59 = vpop.eup %2553  ;;  %v1512_v63 = vmul.f32 %v2552_v58, %v3143_v12  ;;  %v3236_v10 = vadd.f32 %v1527_v7, %v1522_v4 }
 0x790   : > { %v1515_v0 = vmul.f32 %v2554_v59, %v3145_v14  ;;  %v1623_v22 = vpop.permute.xlu1 %1622 }
 0x791   : > { %v1520_v48 = vmul.f32 %v1519_v6, %v1512_v63 }
 0x792   : > { %v2556_v46 = vpop.eup %2555  ;;  %v1523_v18 = vmul.f32 %v1519_v6, %v1515_v0  ;;  %v1598_v0 = vpop.permute.xlu0 %1597 }
 0x793   : > { %v1513_v9 = vmul.f32 %v2556_v46, %v3152_v47  ;;  %v3242_v42 = vadd.f32 %v1527_v7, %v1520_v48  ;;  %v2494_v47 = vld [vmem:[%s3363_s3 + $0x18] sm:$0xff]  }
 0x794   : > { %v3238_v11 = vadd.f32 %v1527_v7, %v1523_v18  ;;  %v1628_v28 = vpop.permute.xlu1 %1627 }
 0x795   : > { %v1521_v61 = vmul.f32 %v1519_v6, %v1513_v9 }
 0x796   : > { %v1569_v62 = vpack.c.bf16 %v3238_v11, %v3236_v10 }
 0x797   : > { %v3244_v12 = vadd.f32 %v1527_v7, %v1521_v61 }
 0x798   : > { %2397 = vmatprep.subr.bf16.mxu1 %v1569_v62  ;;  %v1613_v60 = vpop.permute.xlu1 %1612 }
 0x799   : > { %2398 = vmatpush3.bf16.msra.mxu1 %v1569_v62  ;;  %v1568_v14 = vpack.c.bf16 %v3244_v12, %v3242_v42 }
 0x79b   : > { %2399 = vmatprep.subr.bf16.mxu1 %v1568_v14 }
 0x79c   : > { %v1618_v38 = vpop.permute.xlu1 %1617 }
 0x79d   : > { %2400 = vmatpush3.bf16.msra.mxu1 %v1568_v14  ;;  %v1588_v14 = vpop.permute.xlu0 %1587 }
 0x7a0   : > { %2402 = vmatmul.mubr.msk.bf16.vlgmr.msra.gmra.mxu1 %vm515_vm12, %v2492_v15  ;;  %v1603_v52 = vpop.permute.xlu1 %1602 }
 0x7a1   : > { %2405 = vmatprep.mubr.msk.bf16.mxu1 %vm515_vm12, %v2493_v13 }
 0x7a4   : > { %v1593_v46 = vpop.permute.xlu1 %1592 }
 0x7a8   : > { %2406 = vmatmul.mubr.msk.bf16.gmra.mxu1 %vm515_vm12, %v2494_v47 }
 0x7a9   : > { %2409 = vmatprep.mubr.msk.bf16.mxu1 %vm515_vm12, %v2495_v17  ;;  %v1583_v17 = vpop.permute.xlu1 %1582 }
 0x7b0   : > { %2410 = vmatmul.mubr.msk.bf16.gmra.mxu1 %vm515_vm12, %v2496_v40 }
 0x7b1   : > { %2413 = vmatprep.mubr.msk.bf16.mxu1 %vm515_vm12, %v2497_v26 }
 0x7b8   : > { %2414 = vmatmul.mubr.msk.bf16.gmra.mxu1 %vm515_vm12, %v2498_v3 }
 0x860   : > { %v3279_v21 = vpop.f32.mrf.mxu1 }
 0x862   : > { %v3281_v19 = vpop.f32.mrf.mxu1 }
 0x864   : > { %v2404_v41 = vpop.f32.mrf.mxu1 }
 0x865   : > { %v1760_v3 = vadd.f32 %v2404_v41, %v1588_v14 }
 0x866   : > { %v3283_v8 = vpop.f32.mrf.mxu1 }
 0x868   : > { %v2407_v24 = vpop.f32.mrf.mxu1 }
 0x869   : > { %v1773_v61 = vadd.f32 %v2407_v24, %v1603_v52  ;;  %v1573_v24 = vpop.permute.xlu1 %1572 }
 0x86a   : > { %v1764_v25 = vpop.f32.mrf.mxu1 }
 0x86b   : > { %v1817_v40 = vmax.f32 %v1773_v61, 0.0  ;;  %v1765_v26 = vadd.f32 %v1764_v25, %v1593_v46 }
 0x86c   : > { %v2408_v27 = vpop.f32.mrf.mxu1 }
 0x86d   : > { %v1776_v18 = vadd.f32 %v2408_v27, %v1608_v54  ;;  %v1814_v27 = vmax.f32 %v1760_v3, 0.0 }
 0x86e   : > { %v1767_v29 = vpop.f32.mrf.mxu1 }
 0x86f   : > { %v1818_v15 = vmax.f32 %v1776_v18, 0.0  ;;  %v1768_v13 = vadd.f32 %v1767_v29, %v1598_v0 }
 0x870   : > { %v2411_v30 = vpop.f32.mrf.mxu1 }
 0x871   : > { %v1789_v50 = vadd.f32 %v2411_v30, %v1623_v22  ;;  %v1834_v5 = vpack.c.bf16 %v1818_v15, %v1817_v40  ;;  %v1815_v22 = vmax.f32 %v1765_v26, 0.0 }
 0x872   : > { %v1780_v32 = vpop.f32.mrf.mxu1 }
 0x873   : > { %v1821_v4 = vmax.f32 %v1789_v50, 0.0  ;;  %v1781_v7 = vadd.f32 %v1780_v32, %v1613_v60  ;;  %v1749_v32 = vadd.f32 %v3281_v19, %v1573_v24 }
 0x874   : > { %v2412_v37 = vpop.f32.mrf.mxu1 }
 0x875   : > { %v1792_v35 = vadd.f32 %v2412_v37, %v1628_v28  ;;  %v1819_v62 = vmax.f32 %v1781_v7, 0.0  ;;  %v1811_v60 = vmax.f32 %v1749_v32, 0.0 }
 0x876   : > { %v1783_v1 = vpop.f32.mrf.mxu1 }
 0x877   : > { %v1822_v58 = vmax.f32 %v1792_v35, 0.0  ;;  %v1784_v59 = vadd.f32 %v1783_v1, %v1618_v38  ;;  %v1842_v1 = vpop.permute.xlu1 %1841 }
 0x878   : > { %v2415_v23 = vpop.f32.mrf.mxu1 }
 0x879   : > { %v1805_v39 = vadd.f32 %v2415_v23, %v1643_v55  ;;  %v1836_v9 = vpack.c.bf16 %v1822_v58, %v1821_v4  ;;  %v1820_v48 = vmax.f32 %v1784_v59, 0.0 }
 0x87a   : > { %v1796_v44 = vpop.f32.mrf.mxu1 }
 0x87b   : > { %v1797_v45 = vadd.f32 %v1796_v44, %v1633_v20  ;;  %v1825_v51 = vmax.f32 %v1805_v39, 0.0  ;;  %v1835_v47 = vpack.c.bf16 %v1820_v48, %v1819_v62  ;;  %v1578_v20 = vpop.permute.xlu0 %1577 }
 0x87c   : > { %v2416_v43 = vpop.f32.mrf.mxu1  ;;  %v1752_v28 = vadd.f32 %v3283_v8, %v1578_v20 }
 0x87d   : > { %v1808_v34 = vadd.f32 %v2416_v43, %v1648_v33  ;;  %v1823_v53 = vmax.f32 %v1797_v45, 0.0  ;;  %v1816_v33 = vmax.f32 %v1768_v13, 0.0  ;;  %v1852_v45 = vpop.permute.xlu1 %1851 }
 0x87e   : > { %v1799_v36 = vpop.f32.mrf.mxu1  ;;  %v1812_v41 = vmax.f32 %v1752_v28, 0.0  ;;  %v1986_v28 = vsub.s32 7, %v2725_v2 }
 0x87f   : > { %v1826_v31 = vmax.f32 %v1808_v34, 0.0  ;;  %v1800_v49 = vadd.f32 %v1799_v36, %v1638_v16  ;;  %v1757_v16 = vadd.f32 %v3279_v21, %v1583_v17  ;;  %v1833_v29 = vpack.c.bf16 %v1816_v33, %v1815_v22  ;;  %v2500_v21 = vld [vmem:[%s3364_s4 + $0x8] sm:$0xff]   ;;  %v1847_v8 = vpop.permute.xlu0 %1846 }
 0x880   : > { %v1831_v37 = vpack.c.bf16 %v1812_v41, %v1811_v60  ;;  %v1987_v32 = vrot.slane %v3228_v56, %v1986_v28 }
 0x881   : > { %v1838_v6 = vpack.c.bf16 %v1826_v31, %v1825_v51  ;;  %v1824_v57 = vmax.f32 %v1800_v49, 0.0  ;;  %v1813_v30 = vmax.f32 %v1757_v16, 0.0 }
 0x883   : > { %v1837_v63 = vpack.c.bf16 %v1824_v57, %v1823_v53  ;;  %2417 = vmatprep.subr.bf16.mxu0 %v1838_v6  ;;  %v1832_v25 = vpack.c.bf16 %v1814_v27, %v1813_v30  ;;  %v1857_v38 = vpop.permute.xlu0 %1856  ;;  %v1978_v27 = vsub.s32 6, %v2725_v2 }
 0x884   : > { %2418 = vmatpush3.bf16.msra.mxu0 %v1838_v6 }
 0x885   : > { %2419 = vmatprep.subr.bf16.mxu0 %v1837_v63 }
 0x888   : > { %2420 = vmatpush3.bf16.msra.mxu0 %v1837_v63 }
 0x889   : > { %2421 = vmatprep.subr.bf16.mxu0 %v1836_v9 }
 0x88c   : > { %2422 = vmatpush3.bf16.msra.mxu0 %v1836_v9 }
 0x88d   : > { %2423 = vmatprep.subr.bf16.mxu0 %v1835_v47 }
 0x890   : > { %2424 = vmatpush3.bf16.msra.mxu0 %v1835_v47 }
 0x891   : > { %2425 = vmatprep.subr.bf16.mxu0 %v1834_v5 }
 0x894   : > { %2426 = vmatpush3.bf16.msra.mxu0 %v1834_v5 }
 0x895   : > { %2427 = vmatprep.subr.bf16.mxu0 %v1833_v29 }
 0x898   : > { %2428 = vmatpush3.bf16.msra.mxu0 %v1833_v29  ;;  %v1979_v29 = vrot.slane %v3228_v56, %v1978_v27 }
 0x899   : > { %2429 = vmatprep.subr.bf16.mxu0 %v1832_v25 }
 0x89c   : > { %2430 = vmatpush3.bf16.msra.mxu0 %v1832_v25 }
 0x89d   : > { %2431 = vmatprep.subr.bf16.mxu0 %v1831_v37 }
 0x8a0   : > { %2432 = vmatpush3.bf16.msra.mxu0 %v1831_v37 }
 0x8a3   : > { %2434 = vmatmul.mubr.bf16.vlgmr.msra.gmra.mxu0 %v2500_v21 }
 0x963   : > { %v2435_v55 = vpop.f32.mrf.mxu0 }
 0x964   : > { %v1914_v54 = vadd.f32 %v2435_v55, %v1852_v45 }
 0x965   : > { %v1905_v23 = vpop.f32.mrf.mxu0 }
 0x966   : > { %v1906_v19 = vadd.f32 %v1905_v23, %v1842_v1  ;;  %v1922_v50 = vadd.f32 %v1914_v54, %v3236_v10 }
 0x967   : > { %v2436_v44 = vpop.f32.mrf.mxu0 }
 0x968   : > { %v1917_v39 = vadd.f32 %v2436_v44, %v1857_v38  ;;  %v1920_v43 = vadd.f32 %v1906_v19, %v3242_v42  ;;  %v1930_v42 = vsel %vm515_vm12, %v1922_v50, 0.0 }
 0x969   : > { %v1908_v34 = vpop.f32.mrf.mxu0 }
 0x96a   : > { %v1909_v36 = vadd.f32 %v1908_v34, %v1847_v8  ;;  %v1924_v35 = vsel %vm515_vm12, %v1920_v43, 0.0  ;;  %v1923_v51 = vadd.f32 %v1917_v39, %v3238_v11 }
 0x96b   : > { %1925 = vadd.xlane.f32.xlu1 %v1924_v35 }
 0x96c   : > { %v1921_v31 = vadd.f32 %v1909_v36, %v3244_v12  ;;  %v1933_v52 = vsel %vm515_vm12, %v1923_v51, 0.0 }
 0x96e   : > { %v1927_v49 = vsel %vm515_vm12, %v1921_v31, 0.0 }
 0x96f   : > { %1928 = vadd.xlane.f32.xlu0 %v1927_v49  ;;  %1934 = vadd.xlane.f32.xlu1 %v1933_v52 }
 0x973   : > { %1931 = vadd.xlane.f32.xlu0 %v1930_v42 }
 0x9f4   : > { %v1926_v53 = vpop.xlane.xlu1 %1925 }
 0x9f5   : > { %v1936_v6 = vmul.f32 0.03125, %v1926_v53 }
 0x9f7   : > { %v1940_v57 = vsub.f32 %v1920_v43, %v1936_v6 }
 0x9f8   : > { %v1929_v58 = vpop.xlane.xlu0 %1928  ;;  %v1935_v59 = vpop.xlane.xlu1 %1934 }
 0x9f9   : > { %v1937_v11 = vmul.f32 0.03125, %v1929_v58  ;;  %v1939_v63 = vmul.f32 0.03125, %v1935_v59  ;;  %v1944_v0 = vmul.f32 %v1940_v57, %v1940_v57 }
 0x9fb   : > { %v1941_v12 = vsub.f32 %v1921_v31, %v1937_v11  ;;  %v1943_v4 = vsub.f32 %v1923_v51, %v1939_v63  ;;  %v1948_v7 = vsel %vm515_vm12, %v1944_v0, 0.0 }
 0x9fc   : > { %v1932_v46 = vpop.xlane.xlu0 %1931  ;;  %1949 = vadd.xlane.f32.xlu0 %v1948_v7 }
 0x9fd   : > { %v1938_v10 = vmul.f32 0.03125, %v1932_v46  ;;  %v1945_v18 = vmul.f32 %v1941_v12, %v1941_v12  ;;  %v1947_v61 = vmul.f32 %v1943_v4, %v1943_v4 }
 0x9ff   : > { %v1942_v9 = vsub.f32 %v1922_v50, %v1938_v10  ;;  %v1951_v48 = vsel %vm515_vm12, %v1945_v18, 0.0  ;;  %v1957_v15 = vsel %vm515_vm12, %v1947_v61, 0.0 }
 0xa00   : > { %1952 = vadd.xlane.f32.xlu1 %v1951_v48 }
 0xa01   : > { %v1946_v62 = vmul.f32 %v1942_v9, %v1942_v9 }
 0xa03   : > { %v1954_v14 = vsel %vm515_vm12, %v1946_v62, 0.0 }
 0xa04   : > { %1955 = vadd.xlane.f32.xlu0 %v1954_v14  ;;  %1958 = vadd.xlane.f32.xlu1 %v1957_v15 }
 0xa85   : > { %v1950_v13 = vpop.xlane.xlu0 %1949 }
 0xa86   : > { %v1960_v47 = vmul.f32 0.03125, %v1950_v13 }
 0xa88   : > { %v1964_v17 = vadd.f32 1e-05, %v1960_v47 }
 0xa89   : > { %v1953_v40 = vpop.xlane.xlu1 %1952 }
 0xa8a   : > { %2557 = vrsqrt.f32 %v1964_v17  ;;  %v1961_v26 = vmul.f32 0.03125, %v1953_v40 }
 0xa8c   : > { %v1965_v3 = vadd.f32 1e-05, %v1961_v26 }
 0xa8d   : > { %v1956_v5 = vpop.xlane.xlu0 %1955  ;;  %v1959_v33 = vpop.xlane.xlu1 %1958 }
 0xa8e   : > { %2559 = vrsqrt.f32 %v1965_v3  ;;  %v1962_v20 = vmul.f32 0.03125, %v1956_v5  ;;  %v1963_v16 = vmul.f32 0.03125, %v1959_v33 }
 0xa90   : > { %v1966_v22 = vadd.f32 1e-05, %v1962_v20  ;;  %v1967_v24 = vadd.f32 1e-05, %v1963_v16 }
 0xa92   : > { %2561 = vrsqrt.f32 %v1966_v22 }
 0xa93   : > { %2563 = vrsqrt.f32 %v1967_v24 }
 0xa97   : > { %v2558_v30 = vpop.eup %2557 }
 0xa98   : > { %v1972_v25 = vmul.f32 %v2558_v30, %v1940_v57 }
 0xa9a   : > { %v1980_v41 = vmul.f32 %v1979_v29, %v1972_v25 }
 0xa9b   : > { %v2560_v60 = vpop.eup %2559 }
 0xa9c   : > { %v1988_v37 = vadd.f32 %v1987_v32, %v1980_v41  ;;  %v1973_v21 = vmul.f32 %v2560_v60, %v1941_v12 }
 0xa9e   : > { %v1981_v8 = vmul.f32 %v1979_v29, %v1973_v21  ;;  %1992 = vst.msk [vmem:[%s245_s26] sm:$0xff] %vm515_vm12, %v1988_v37 }
 0xa9f   : > { %v2562_v1 = vpop.eup %2561 }
 0xaa0   : > { %v2564_v55 = vpop.eup %2563  ;;  %v1989_v2 = vadd.f32 %v1987_v32, %v1981_v8  ;;  %v1974_v23 = vmul.f32 %v2562_v1, %v1942_v9 }
 0xaa1   : > { %v1975_v19 = vmul.f32 %v2564_v55, %v1943_v4 }
 0xaa2   : > { %v1982_v38 = vmul.f32 %v1979_v29, %v1974_v23  ;;  %1993 = vst.msk [vmem:[%s245_s26 + $0x8] sm:$0xff] %vm515_vm12, %v1989_v2 }
 0xaa3   : > { %v1983_v56 = vmul.f32 %v1979_v29, %v1975_v19 }
 0xaa4   : > { %v1990_v44 = vadd.f32 %v1987_v32, %v1982_v38 }
 0xaa5   : > { %v1991_v39 = vadd.f32 %v1987_v32, %v1983_v56 }
 0xaa6   : > { %1994 = vst.msk [vmem:[%s245_s26 + $0x10] sm:$0xff] %vm515_vm12, %v1990_v44 }
 0xaa7   : > { %1995 = vst.msk [vmem:[%s245_s26 + $0x18] sm:$0xff] %vm515_vm12, %v1991_v39 }
 0xaa8   : > { %2583 = shalt.err (!%p2580_p3)
}
 0xaa9   : > { %s2584_s17 = scalar_lea.hbm %s3314_s11, 512  ;;  %s2588_s19 = scalar_lea.hbm %s3366_s6, 1024 }
 0xaaa   : > { %p2585_p4 = scmp.ne.s32.totalorder %s3314_s11, %s2584_s17  ;;  %p2589_p9 = scmp.lt.s32.totalorder %s3314_s11, %s3366_s6 }
 0xaab   : > { %p2590_p10 = scmp.lt.s32.totalorder %s2588_s19, %s2584_s17 }
 0xaac   : > { %p2586_p7 = pnand %p2585_p4, %p2711_p5 }
 0xaad   : > { %p2591_p11 = por %p2590_p10, %p2589_p9 }
 0xaae   : > { %p2587_p8 = pneg %p2586_p7 }
 0xab0   : > { %p2592_p12 = pnand %p2591_p11, %p2587_p8 }
 0xab2   : > { %2595 = shalt.err (!%p2592_p12)
}
 0xab3   : > { %s2636_s28 = smov 128   ;;  %s2637_s9 = smov 8  }
 0xab4   : > { %2437 = dma.vmem_to_hbm [thread:$0]  (%p2711_p5), %s3316_s29, 512, %s3314_s11, %s3320_s25, %s2636_s28, %s2636_s28, %s2637_s9  }
 0xab5 PF: > { %p2443_p13 = scmp.ge.s32.totalorder %s2630_s24, 2  ;;  %s2025_s10 = sand.u32 1, %s2618_s21  }
 0xab6   : > { %s2026_s12 = scalar_lea.sflag [#allocation3], %s2025_s10 }
 0xab7   : > { %p2440_p0 = pnand %p2443_p13, %p2715_p6 }
 0xab9   : > { %p2441_p1 = pneg %p2440_p0 }
 0xabb   : > { %2613 = dma.done.wait (%p2441_p1), %s2026_s12, 512  }
 0xabc   : > { %2615 = vsyncadd (%p2441_p1), %s2026_s12, 4294966784  ;;  %p16_p2 = scmp.ge.s32.totalorder %s2698_s27, 4   ;;  %s3369_s21 = smov %s2622_s22 }
 0xabd   : > { %s3370_s22 = smov %s2626_s23  ;;  %s3371_s23 = smov %s2709_s30 }
 0xabe   : > { %s3372_s24 = smov %s2698_s27  ;;  %18 = sbr.rel (!%p16_p2) target bundleno = 3 (0x3), region = 82 }
 0xac3   :  { %2031 = vsyncpa [#allocation3], 1 }
 0xac4   :  { %2033 = vsyncpa [#allocation3 + $0x1], 1 }

</bundles_post_ra>
